<compile_context>
chip_gen: v7x
topology: tpu7x:2x2x1
jax: 0.10.0
libtpu: 0.0.40
codegen_flags: <defaults>
</compile_context>

<pallas_src>
import jax
import jax.numpy as jnp
from jax.experimental import pallas as pl
from jax.experimental.pallas import tpu as pltpu


def _mlp_kernel(x_ref,
                w1_ref, b1_ref,
                w2_ref, b2_ref,
                w3_ref, b3_ref,
                w4_ref, b4_ref,
                w5_ref, b5_ref,
                o_ref):
    # Five back-to-back MXU matmuls with f32 accumulation; ReLUs on the VPU.
    cdt = w1_ref.dtype                      # MXU operand dtype (f32 or bf16)
    # In-kernel cast (no-op when cdt == f32): avoids a separate XLA pass over x.
    h = x_ref[...].astype(cdt)

    h = jnp.dot(h, w1_ref[...], preferred_element_type=jnp.float32) + b1_ref[...]
    h = jnp.maximum(h, 0.0)

    h = jnp.dot(h.astype(cdt), w2_ref[...],
                preferred_element_type=jnp.float32) + b2_ref[...]
    h = jnp.maximum(h, 0.0)

    h = jnp.dot(h.astype(cdt), w3_ref[...],
                preferred_element_type=jnp.float32) + b3_ref[...]
    h = jnp.maximum(h, 0.0)

    h = jnp.dot(h.astype(cdt), w4_ref[...],
                preferred_element_type=jnp.float32) + b4_ref[...]
    h = jnp.maximum(h, 0.0)

    h = jnp.dot(h.astype(cdt), w5_ref[...],
                preferred_element_type=jnp.float32) + b5_ref[...]

    o_ref[...] = h.astype(o_ref.dtype)


def prepare_params(params, compute_dtype=jnp.float32):
    """One-time param prep: flatten to (w1,b1,...,w5,b5), weights in compute_dtype
    (f32 or bf16 for v6e/v7x), biases kept f32 (added to the f32 accumulators)."""
    flat = []
    for w, b in params:
        flat.append(jnp.asarray(w, compute_dtype))
        flat.append(jnp.asarray(b, jnp.float32).reshape(1, -1))
    return tuple(flat)


def net_forward(x, flat_params, *, tile_b=1024, out_dtype=jnp.float32):
    """Forward pass.

    x:           [batch, state_size] float32 (left untouched in the wrapper)
    flat_params: output of prepare_params()
    tile_b:      batch tile (multiple of 8); sweep 1024-4096 for very large batches
    out_dtype:   float32 (default) or bfloat16 if downstream consumers accept it
    """
    batch, state_size = x.shape
    action_size = flat_params[-1].shape[-1]

    # Batch tile: multiple of 8 (f32 sublanes). Cap at ~ceil(batch/2) so there are
    # at least two grid steps whenever possible -> v7x shards the "parallel" axis
    # across both TensorCores. The cap is irrelevant once batch >> 2*tile_b.
    tile_b = max(8, (int(tile_b) // 8) * 8)
    two_way = max(8, ((pl.cdiv(batch, 2) + 7) // 8) * 8)
    tile_b = min(tile_b, two_way)
    num_tiles = pl.cdiv(batch, tile_b)      # ragged last tile handled by Pallas

    # x tiled along batch; weights/biases use constant block indices so they are
    # DMA'd once and stay VMEM-resident across the whole grid.
    in_specs = [pl.BlockSpec((tile_b, state_size), lambda i: (i, 0))]
    for p in flat_params:
        in_specs.append(pl.BlockSpec(p.shape, lambda i: (0, 0)))
    out_spec = pl.BlockSpec((tile_b, action_size), lambda i: (i, 0))

    return pl.pallas_call(
        _mlp_kernel,
        out_shape=jax.ShapeDtypeStruct((batch, action_size), out_dtype),
        grid=(num_tiles,),
        in_specs=in_specs,
        out_specs=out_spec,
        compiler_params=pltpu.CompilerParams(
            dimension_semantics=("parallel",)),
    )(x, *flat_params)


def init_params(key, state_size, action_size):
    """Deterministic init mimicking torch.nn.Linear default (uniform +-1/sqrt(fan_in))."""
    sizes = [(state_size, 16), (16, 32), (32, 32), (32, 16), (16, action_size)]
    params = []
    for fan_in, fan_out in sizes:
        key, kw, kb = jax.random.split(key, 3)
        bound = 1.0 / jnp.sqrt(jnp.float32(fan_in))
        w = jax.random.uniform(kw, (fan_in, fan_out), jnp.float32, -bound, bound)
        b = jax.random.uniform(kb, (1, fan_out), jnp.float32, -bound, bound)
        params.append((w, b))
    return params


def reference_forward(x, params):
    h = x
    for i, (w, b) in enumerate(params):
        h = h @ w + b
        if i < len(params) - 1:
            h = jnp.maximum(h, 0.0)
    return h


if __name__ == "__main__":
    key = jax.random.PRNGKey(0)
    state_size, action_size = 8, 4
    batch = 500  # not a multiple of the tile -> exercises Pallas boundary blocks

    kx, kp = jax.random.split(key)
    x = jax.random.normal(kx, (batch, state_size), jnp.float32)
    params = init_params(kp, state_size, action_size)

    ref = reference_forward(x, params)

    # f32 path (default; best on v5e)
    flat_f32 = prepare_params(params, jnp.float32)   # one-time prep, not per call
    out_f32 = jax.block_until_ready(net_forward(x, flat_f32, tile_b=1024))
    assert out_f32.shape == (batch, action_size)
    assert jnp.allclose(out_f32, ref, atol=1e-4, rtol=1e-4), "f32 mismatch vs reference"

    # bf16-weight path (v6e/v7x option); x cast happens in-kernel, accumulation f32
    flat_bf16 = prepare_params(params, jnp.bfloat16)
    out_bf16 = jax.block_until_ready(net_forward(x, flat_bf16, tile_b=1024))
    assert out_bf16.shape == (batch, action_size)
    assert jnp.allclose(out_bf16, ref, atol=5e-2, rtol=5e-2), "bf16 mismatch vs reference"

    print("KERNEL_OK")
</pallas_src>

<mosaic_0001>
module attributes {stable_mosaic.version = 11 : i64} {
  func.func @_mlp_kernel(%arg0: i32, %arg1: memref<256x8xf32, #tpu.memory_space<vmem>>, %arg2: memref<8x16xf32, #tpu.memory_space<vmem>>, %arg3: memref<1x16xf32, #tpu.memory_space<vmem>>, %arg4: memref<16x32xf32, #tpu.memory_space<vmem>>, %arg5: memref<1x32xf32, #tpu.memory_space<vmem>>, %arg6: memref<32x32xf32, #tpu.memory_space<vmem>>, %arg7: memref<1x32xf32, #tpu.memory_space<vmem>>, %arg8: memref<32x16xf32, #tpu.memory_space<vmem>>, %arg9: memref<1x16xf32, #tpu.memory_space<vmem>>, %arg10: memref<16x4xf32, #tpu.memory_space<vmem>>, %arg11: memref<1x4xf32, #tpu.memory_space<vmem>>, %arg12: memref<256x4xf32, #tpu.memory_space<vmem>>) attributes {dimension_semantics = [#tpu.dimension_semantics<parallel>], iteration_bounds = array<i64: 2>, scalar_prefetch = 0 : i64, scratch_operands = 0 : i64, tpu.core_type = #tpu.core_type<tc>, window_params = [{transform_indices = @transform_0, window_bounds = array<i64: 256, 8>}, {pipeline_mode = #tpu.pipeline_mode<synchronous>, transform_indices = @transform_1, window_bounds = array<i64: 8, 16>}, {pipeline_mode = #tpu.pipeline_mode<synchronous>, transform_indices = @transform_2, window_bounds = array<i64: 1, 16>}, {pipeline_mode = #tpu.pipeline_mode<synchronous>, transform_indices = @transform_3, window_bounds = array<i64: 16, 32>}, {pipeline_mode = #tpu.pipeline_mode<synchronous>, transform_indices = @transform_4, window_bounds = array<i64: 1, 32>}, {pipeline_mode = #tpu.pipeline_mode<synchronous>, transform_indices = @transform_5, window_bounds = array<i64: 32, 32>}, {pipeline_mode = #tpu.pipeline_mode<synchronous>, transform_indices = @transform_6, window_bounds = array<i64: 1, 32>}, {pipeline_mode = #tpu.pipeline_mode<synchronous>, transform_indices = @transform_7, window_bounds = array<i64: 32, 16>}, {pipeline_mode = #tpu.pipeline_mode<synchronous>, transform_indices = @transform_8, window_bounds = array<i64: 1, 16>}, {pipeline_mode = #tpu.pipeline_mode<synchronous>, transform_indices = @transform_9, window_bounds = array<i64: 16, 4>}, {pipeline_mode = #tpu.pipeline_mode<synchronous>, transform_indices = @transform_10, window_bounds = array<i64: 1, 4>}, {transform_indices = @transform_11, window_bounds = array<i64: 256, 4>}]} {
    %c0 = arith.constant 0 : index
    %c0_0 = arith.constant 0 : index
    %0 = vector.load %arg1[%c0, %c0_0] : memref<256x8xf32, #tpu.memory_space<vmem>>, vector<256x8xf32>
    %c0_1 = arith.constant 0 : index
    %c0_2 = arith.constant 0 : index
    %1 = vector.load %arg2[%c0_1, %c0_2] : memref<8x16xf32, #tpu.memory_space<vmem>>, vector<8x16xf32>
    %cst = arith.constant dense<0.000000e+00> : vector<256x16xf32>
    %2 = tpu.matmul %0, %1, %cst {dimension_numbers = #tpu.dot_dimension_numbers<[1], [0], [0], [1], [0, 0, 1, 1], [], []>} : vector<256x8xf32>, vector<8x16xf32>, vector<256x16xf32> -> vector<256x16xf32>
    %c0_3 = arith.constant 0 : index
    %c0_4 = arith.constant 0 : index
    %3 = vector.load %arg3[%c0_3, %c0_4] : memref<1x16xf32, #tpu.memory_space<vmem>>, vector<1x16xf32>
    %4 = vector.broadcast %3 : vector<1x16xf32> to vector<256x16xf32>
    %5 = arith.addf %2, %4 : vector<256x16xf32>
    %cst_5 = arith.constant 0.000000e+00 : f32
    %6 = vector.broadcast %cst_5 : f32 to vector<256x16xf32>
    %7 = arith.maximumf %5, %6 : vector<256x16xf32>
    %c0_6 = arith.constant 0 : index
    %c0_7 = arith.constant 0 : index
    %8 = vector.load %arg4[%c0_6, %c0_7] : memref<16x32xf32, #tpu.memory_space<vmem>>, vector<16x32xf32>
    %cst_8 = arith.constant dense<0.000000e+00> : vector<256x32xf32>
    %9 = tpu.matmul %7, %8, %cst_8 {dimension_numbers = #tpu.dot_dimension_numbers<[1], [0], [0], [1], [0, 0, 1, 1], [], []>} : vector<256x16xf32>, vector<16x32xf32>, vector<256x32xf32> -> vector<256x32xf32>
    %c0_9 = arith.constant 0 : index
    %c0_10 = arith.constant 0 : index
    %10 = vector.load %arg5[%c0_9, %c0_10] : memref<1x32xf32, #tpu.memory_space<vmem>>, vector<1x32xf32>
    %11 = vector.broadcast %10 : vector<1x32xf32> to vector<256x32xf32>
    %12 = arith.addf %9, %11 : vector<256x32xf32>
    %cst_11 = arith.constant 0.000000e+00 : f32
    %13 = vector.broadcast %cst_11 : f32 to vector<256x32xf32>
    %14 = arith.maximumf %12, %13 : vector<256x32xf32>
    %c0_12 = arith.constant 0 : index
    %c0_13 = arith.constant 0 : index
    %15 = vector.load %arg6[%c0_12, %c0_13] : memref<32x32xf32, #tpu.memory_space<vmem>>, vector<32x32xf32>
    %cst_14 = arith.constant dense<0.000000e+00> : vector<256x32xf32>
    %16 = tpu.matmul %14, %15, %cst_14 {dimension_numbers = #tpu.dot_dimension_numbers<[1], [0], [0], [1], [0, 0, 1, 1], [], []>} : vector<256x32xf32>, vector<32x32xf32>, vector<256x32xf32> -> vector<256x32xf32>
    %c0_15 = arith.constant 0 : index
    %c0_16 = arith.constant 0 : index
    %17 = vector.load %arg7[%c0_15, %c0_16] : memref<1x32xf32, #tpu.memory_space<vmem>>, vector<1x32xf32>
    %18 = vector.broadcast %17 : vector<1x32xf32> to vector<256x32xf32>
    %19 = arith.addf %16, %18 : vector<256x32xf32>
    %cst_17 = arith.constant 0.000000e+00 : f32
    %20 = vector.broadcast %cst_17 : f32 to vector<256x32xf32>
    %21 = arith.maximumf %19, %20 : vector<256x32xf32>
    %c0_18 = arith.constant 0 : index
    %c0_19 = arith.constant 0 : index
    %22 = vector.load %arg8[%c0_18, %c0_19] : memref<32x16xf32, #tpu.memory_space<vmem>>, vector<32x16xf32>
    %cst_20 = arith.constant dense<0.000000e+00> : vector<256x16xf32>
    %23 = tpu.matmul %21, %22, %cst_20 {dimension_numbers = #tpu.dot_dimension_numbers<[1], [0], [0], [1], [0, 0, 1, 1], [], []>} : vector<256x32xf32>, vector<32x16xf32>, vector<256x16xf32> -> vector<256x16xf32>
    %c0_21 = arith.constant 0 : index
    %c0_22 = arith.constant 0 : index
    %24 = vector.load %arg9[%c0_21, %c0_22] : memref<1x16xf32, #tpu.memory_space<vmem>>, vector<1x16xf32>
    %25 = vector.broadcast %24 : vector<1x16xf32> to vector<256x16xf32>
    %26 = arith.addf %23, %25 : vector<256x16xf32>
    %cst_23 = arith.constant 0.000000e+00 : f32
    %27 = vector.broadcast %cst_23 : f32 to vector<256x16xf32>
    %28 = arith.maximumf %26, %27 : vector<256x16xf32>
    %c0_24 = arith.constant 0 : index
    %c0_25 = arith.constant 0 : index
    %29 = vector.load %arg10[%c0_24, %c0_25] : memref<16x4xf32, #tpu.memory_space<vmem>>, vector<16x4xf32>
    %cst_26 = arith.constant dense<0.000000e+00> : vector<256x4xf32>
    %30 = tpu.matmul %28, %29, %cst_26 {dimension_numbers = #tpu.dot_dimension_numbers<[1], [0], [0], [1], [0, 0, 1, 1], [], []>} : vector<256x16xf32>, vector<16x4xf32>, vector<256x4xf32> -> vector<256x4xf32>
    %c0_27 = arith.constant 0 : index
    %c0_28 = arith.constant 0 : index
    %31 = vector.load %arg11[%c0_27, %c0_28] : memref<1x4xf32, #tpu.memory_space<vmem>>, vector<1x4xf32>
    %32 = vector.broadcast %31 : vector<1x4xf32> to vector<256x4xf32>
    %33 = arith.addf %30, %32 : vector<256x4xf32>
    %c0_29 = arith.constant 0 : index
    %c0_30 = arith.constant 0 : index
    %34 = vector.load %arg12[%c0_29, %c0_30] : memref<256x4xf32, #tpu.memory_space<vmem>>, vector<256x4xf32>
    tpu.vector_store %arg12[%c0_29, %c0_30], %33 {strides = array<i32>} : memref<256x4xf32, #tpu.memory_space<vmem>>, vector<256x4xf32>,
    return
  }
  func.func @transform_0(%arg0: i32) -> (i32, i32) {
    %c0_i32 = arith.constant 0 : i32
    %c0_i32_0 = arith.constant 0 : i32
    return %arg0, %c0_i32 : i32, i32
  }
  func.func @transform_1(%arg0: i32) -> (i32, i32) {
    %c0_i32 = arith.constant 0 : i32
    %c0_i32_0 = arith.constant 0 : i32
    %c0_i32_1 = arith.constant 0 : i32
    return %c0_i32, %c0_i32_0 : i32, i32
  }
  func.func @transform_2(%arg0: i32) -> (i32, i32) {
    %c0_i32 = arith.constant 0 : i32
    %c0_i32_0 = arith.constant 0 : i32
    %c0_i32_1 = arith.constant 0 : i32
    return %c0_i32, %c0_i32_0 : i32, i32
  }
  func.func @transform_3(%arg0: i32) -> (i32, i32) {
    %c0_i32 = arith.constant 0 : i32
    %c0_i32_0 = arith.constant 0 : i32
    %c0_i32_1 = arith.constant 0 : i32
    return %c0_i32, %c0_i32_0 : i32, i32
  }
  func.func @transform_4(%arg0: i32) -> (i32, i32) {
    %c0_i32 = arith.constant 0 : i32
    %c0_i32_0 = arith.constant 0 : i32
    %c0_i32_1 = arith.constant 0 : i32
    return %c0_i32, %c0_i32_0 : i32, i32
  }
  func.func @transform_5(%arg0: i32) -> (i32, i32) {
    %c0_i32 = arith.constant 0 : i32
    %c0_i32_0 = arith.constant 0 : i32
    %c0_i32_1 = arith.constant 0 : i32
    return %c0_i32, %c0_i32_0 : i32, i32
  }
  func.func @transform_6(%arg0: i32) -> (i32, i32) {
    %c0_i32 = arith.constant 0 : i32
    %c0_i32_0 = arith.constant 0 : i32
    %c0_i32_1 = arith.constant 0 : i32
    return %c0_i32, %c0_i32_0 : i32, i32
  }
  func.func @transform_7(%arg0: i32) -> (i32, i32) {
    %c0_i32 = arith.constant 0 : i32
    %c0_i32_0 = arith.constant 0 : i32
    %c0_i32_1 = arith.constant 0 : i32
    return %c0_i32, %c0_i32_0 : i32, i32
  }
  func.func @transform_8(%arg0: i32) -> (i32, i32) {
    %c0_i32 = arith.constant 0 : i32
    %c0_i32_0 = arith.constant 0 : i32
    %c0_i32_1 = arith.constant 0 : i32
    return %c0_i32, %c0_i32_0 : i32, i32
  }
  func.func @transform_9(%arg0: i32) -> (i32, i32) {
    %c0_i32 = arith.constant 0 : i32
    %c0_i32_0 = arith.constant 0 : i32
    %c0_i32_1 = arith.constant 0 : i32
    return %c0_i32, %c0_i32_0 : i32, i32
  }
  func.func @transform_10(%arg0: i32) -> (i32, i32) {
    %c0_i32 = arith.constant 0 : i32
    %c0_i32_0 = arith.constant 0 : i32
    %c0_i32_1 = arith.constant 0 : i32
    return %c0_i32, %c0_i32_0 : i32, i32
  }
  func.func @transform_11(%arg0: i32) -> (i32, i32) {
    %c0_i32 = arith.constant 0 : i32
    %c0_i32_0 = arith.constant 0 : i32
    return %arg0, %c0_i32 : i32, i32
  }
}

</mosaic_0001>

<bundles_post_ra>
// kernel: tpu_custom_call.1
= control target key start
LH: loop header
LB: loop body
LE: loop exit
PB: predicated region body
PF: predicated region fallthrough
CT: control target
= control target key end

     0   :  { %s3489_s17 = smov 0   ;;  %s3491_s18 = smov 0   ;;  %s4159_s0 = inlined_call_operand.vmem [shape: f32[500,8], index: 0, kind: input, shape index: {}]   ;;  %s4160_s1 = inlined_call_operand.vmem [shape: f32[8,16], index: 1, kind: input, shape index: {}]   ;;  %s4161_s2 = inlined_call_operand.vmem [shape: f32[1,16], index: 2, kind: input, shape index: {}]   ;;  %s4162_s3 = inlined_call_operand.vmem [shape: f32[16,32], index: 3, kind: input, shape index: {}]   ;;  %s4163_s4 = inlined_call_operand.vmem [shape: f32[1,32], index: 4, kind: input, shape index: {}]   ;;  %s4164_s5 = inlined_call_operand.vmem [shape: f32[32,32], index: 5, kind: input, shape index: {}]   ;;  %s4165_s6 = inlined_call_operand.vmem [shape: f32[1,32], index: 6, kind: input, shape index: {}]   ;;  %s4166_s7 = inlined_call_operand.vmem [shape: f32[32,16], index: 7, kind: input, shape index: {}]   ;;  %s4167_s8 = inlined_call_operand.vmem [shape: f32[1,16], index: 8, kind: input, shape index: {}]   ;;  %s4168_s9 = inlined_call_operand.vmem [shape: f32[16,4], index: 9, kind: input, shape index: {}]   ;;  %s4169_s10 = inlined_call_operand.vmem [shape: f32[1,4], index: 10, kind: input, shape index: {}]   ;;  %s4170_s11 = inlined_call_operand.vmem [shape: f32[500,4], index: 11, kind: output, shape index: {}]  }
   0x1   :  { %s3493_s19 = smov 0  }
   0x2 LB: > { %s3502_s20 = sadd.s32 4294967295, %s3395_s19   ;;  %s3504_s21 = sadd.s32 1, %s3395_s19   ;;  %s3395_s19 = sphi %s3493_s19, %s4179_s19   ;;  %s3391_s18 = sphi %s3491_s18, %s4178_s18   ;;  %s3387_s17 = sphi %s3489_s17, %s4177_s17  }
   0x3   : > { %s261_s22 = ssub.s32 %s3395_s19, %s3504_s21  ;;  %s264_s23 = sadd.s32 1, %s3391_s18 }
   0x4   : > { %p262_p0 = scmp.eq.s32.totalorder %s261_s22, 0  ;;  %p274_p1 = scmp.ne.s32.totalorder %s3391_s18, %s3387_s17 }
   0x5   : > { %p275_p2 = scmp.eq.s32.totalorder %s3502_s20, 1  ;;  %p2599_p3 = scmp.ge.s32.totalorder %s3395_s19, 1 }
   0x6   : > { %s3512_s24 = scalar_select %p262_p0, %s3391_s18, %s264_s23  }
   0x7   : > { %p3514_p4 = por %p275_p2, %p274_p1  ;;  %p346_p5 = scmp.lt.s32.totalorder %s3395_s19, 3 }
   0x9   : > { %p347_p6 = pnand %p2599_p3, %p346_p5 }
   0xa   : > { %v440_v0 = vld [vmem:[%s4160_s1] sm:$0xff] (!%p347_p6)  ;;  %s3522_s28 = sshll.u32 (!%p347_p6), %s3502_s20, 5  ;;  %v803_v2 = vld [vmem:[%s4162_s3 + $0x8] sm:$0xff] (!%p347_p6)  ;;  %vm448_vm0 = vcmask (!%p347_p6), 64512   ;;  %v1167_v38 = vld [vmem:[%s4164_s5 + $0x10] sm:$0xff] (!%p347_p6)  ;;  %vm811_vm1 = vcmask (!%p347_p6), 130048  }
   0xb   : > { %350 = sbr.rel (%p347_p6) target bundleno = 1228 (0x4cc), region = 64  ;;  %v802_v1 = vld [vmem:[%s4162_s3] sm:$0xff] (!%p347_p6)  ;;  %2961 = vmatprep.subr.mxu0 (!%p347_p6), %v440_v0  ;;  %p394_p7 = scmp.lt.s32.totalorder (!%p347_p6), %s3522_s28, 62  ;;  %3251 = vmatprep.subr.mxu1 (!%p347_p6), %v440_v0  ;;  %v1166_v37 = vld [vmem:[%s4164_s5 + $0x8] sm:$0xff] (!%p347_p6)  ;;  %v1168_v40 = vld [vmem:[%s4164_s5 + $0x18] sm:$0xff] (!%p347_p6)  ;;  %vm1176_vm2 = vcmask (!%p347_p6), 261120  }
   0xc   : > { %v3227_v3 = vpack.c.bf16 (!%p347_p6), %v803_v2, %v802_v1  ;;  %2962 = vmatpush3.msra.mxu0 (!%p347_p6), %v440_v0  ;;  %3252 = vmatpush3.msra.mxu1 (!%p347_p6), %v440_v0  ;;  %v1165_v36 = vld [vmem:[%s4164_s5] sm:$0xff] (!%p347_p6)  ;;  %v3235_v41 = vpack.c.bf16 (!%p347_p6), %v1168_v40, %v1167_v38  ;;  %s386_s30 = sand.u32 (!%p347_p6), 1, %s3387_s17   ;;  %vm2224_vm3 = vcmask (!%p347_p6), 31744  }
   0xd   : > { %v3231_v39 = vpack.c.bf16 (!%p347_p6), %v1166_v37, %v1165_v36  ;;  %v3616_v42 = vld [vmem:[%s4161_s2] ss:$0 sm:$0xff] (!%p347_p6)  ;;  %s2600_s12 = sshll.u32 (!%p347_p6), %s386_s30, 8 }
   0xe   : > { %3228 = vmatprep.subr.bf16.mxu1 (!%p347_p6), %v3227_v3 }
   0xf   : > { %3232 = vmatprep.subr.bf16.mxu0 (!%p347_p6), %v3231_v39 }
  0x12   : > { %s395_s14 = scalar_select %p394_p7, %s3522_s28, 62 }
  0x13   : > { %s2265_s17 = ssub.s32 (%p3514_p4), 63, %s3522_s28  ;;  %s2785_s16 = sshll.u32 (%p3514_p4), %s3502_s20, 8 }
  0x14   : > { %s2602_s15 = sshll.u32 %s395_s14, 3  ;;  %p2266_p8 = scmp.lt.s32.totalorder (%p3514_p4), %s2265_s17, 32 }
  0x15   : > { %s3535_s22 = scalar_lea.vmem %s4159_s0, %s2602_s15  ;;  %s3924_s15 = scalar_lea.vmem [#allocation2], %s2600_s12  }
  0x16   : > { %v408_v4 = vld [vmem:[%s3535_s22] sm:$0xff]  ;;  %v409_v5 = vld [vmem:[%s3535_s22 + $0x8] sm:$0xff]  ;;  %v410_v6 = vld [vmem:[%s3535_s22 + $0x10] sm:$0xff]  ;;  %s4027_s23 = scalar_lea.vmem (%p3514_p4), %s4170_s11, %s2785_s16  }
  0x17   : > { %2963 = vmatprep.mubr.msk.f32.mxu0 %vm448_vm0, %v408_v4  ;;  %v411_v7 = vld [vmem:[%s3535_s22 + $0x18] sm:$0xff]  ;;  %v412_v8 = vld [vmem:[%s3535_s22 + $0x20] sm:$0xff]  ;;  %v425_v10 = vld [vmem:[%s3535_s22 + $0x88] sm:$0xff] }
  0x18   : > { %2964 = vmatmul.mubr.msk.f32.vlgmr.msra.gmra.mrb[0].mxu0 %vm448_vm0, %v409_v5  ;;  %v424_v9 = vld [vmem:[%s3535_s22 + $0x80] sm:$0xff]  ;;  %v426_v11 = vld [vmem:[%s3535_s22 + $0x90] sm:$0xff]  ;;  %v413_v12 = vld [vmem:[%s3535_s22 + $0x28] sm:$0xff] }
  0x19   : > { %2966 = vmatprep.mubr.msk.f32.mxu0 %vm448_vm0, %v410_v6  ;;  %2987 = vmatprep.mubr.msk.f32.mxu1 %vm448_vm0, %v424_v9  ;;  %v414_v13 = vld [vmem:[%s3535_s22 + $0x30] sm:$0xff]  ;;  %v427_v14 = vld [vmem:[%s3535_s22 + $0x98] sm:$0xff]  ;;  %v428_v15 = vld [vmem:[%s3535_s22 + $0xa0] sm:$0xff] }
  0x1a   : > { %2988 = vmatmul.mubr.msk.f32.vlgmr.msra.gmra.mrb[0].mxu1 %vm448_vm0, %v425_v10  ;;  %v415_v16 = vld [vmem:[%s3535_s22 + $0x38] sm:$0xff]  ;;  %v416_v17 = vld [vmem:[%s3535_s22 + $0x40] sm:$0xff]  ;;  %v429_v18 = vld [vmem:[%s3535_s22 + $0xa8] sm:$0xff]  ;;  %3234 = vmatpush3.bf16.msra.mxu0 %v3231_v39 }
  0x1b   : > { %2990 = vmatprep.mubr.msk.f32.mxu1 %vm448_vm0, %v426_v11  ;;  %3230 = vmatpush3.bf16.msra.mxu1 %v3227_v3  ;;  %v430_v19 = vld [vmem:[%s3535_s22 + $0xb0] sm:$0xff]  ;;  %v417_v20 = vld [vmem:[%s3535_s22 + $0x48] sm:$0xff]  ;;  %v431_v22 = vld [vmem:[%s3535_s22 + $0xb8] sm:$0xff] }
  0x1c   : > { %2967 = vmatmul.mubr.msk.f32.gmra.mrb[2].mxu0 %vm448_vm0, %v411_v7  ;;  %v418_v21 = vld [vmem:[%s3535_s22 + $0x50] sm:$0xff]  ;;  %v432_v23 = vld [vmem:[%s3535_s22 + $0xc0] sm:$0xff]  ;;  %v419_v24 = vld [vmem:[%s3535_s22 + $0x58] sm:$0xff]  ;;  %3236 = vmatprep.subr.bf16.mxu0 %v3235_v41 }
  0x1d   : > { %2969 = vmatprep.mubr.msk.f32.mxu0 %vm448_vm0, %v412_v8  ;;  %v420_v25 = vld [vmem:[%s3535_s22 + $0x60] sm:$0xff]  ;;  %v433_v26 = vld [vmem:[%s3535_s22 + $0xc8] sm:$0xff]  ;;  %v434_v27 = vld [vmem:[%s3535_s22 + $0xd0] sm:$0xff] }
  0x1e   : > { %2991 = vmatmul.mubr.msk.f32.gmra.mrb[2].mxu1 %vm448_vm0, %v427_v14  ;;  %v421_v28 = vld [vmem:[%s3535_s22 + $0x68] sm:$0xff]  ;;  %v422_v29 = vld [vmem:[%s3535_s22 + $0x70] sm:$0xff]  ;;  %v435_v30 = vld [vmem:[%s3535_s22 + $0xd8] sm:$0xff]  ;;  %3238 = vmatpush3.bf16.msra.mxu0 %v3235_v41 }
  0x1f   : > { %2993 = vmatprep.mubr.msk.f32.mxu1 %vm448_vm0, %v428_v15  ;;  %v436_v31 = vld [vmem:[%s3535_s22 + $0xe0] sm:$0xff]  ;;  %v423_v32 = vld [vmem:[%s3535_s22 + $0x78] sm:$0xff]  ;;  %v437_v33 = vld [vmem:[%s3535_s22 + $0xe8] sm:$0xff] }
  0x20   : > { %2970 = vmatmul.mubr.msk.f32.gmra.mrb[4].mxu0 %vm448_vm0, %v413_v12  ;;  %v438_v34 = vld [vmem:[%s3535_s22 + $0xf0] sm:$0xff]  ;;  %v439_v35 = vld [vmem:[%s3535_s22 + $0xf8] sm:$0xff] }
  0x21   : > { %2972 = vmatprep.mubr.msk.f32.mxu0 %vm448_vm0, %v414_v13 }
  0x22   : > { %2994 = vmatmul.mubr.msk.f32.gmra.mrb[4].mxu1 %vm448_vm0, %v429_v18 }
  0x23   : > { %2996 = vmatprep.mubr.msk.f32.mxu1 %vm448_vm0, %v430_v19 }
  0x24   : > { %2973 = vmatmul.mubr.msk.f32.gmra.mrb[6].mxu0 %vm448_vm0, %v415_v16 }
  0x25   : > { %2975 = vmatprep.mubr.msk.f32.mxu0 %vm448_vm0, %v416_v17 }
  0x26   : > { %2997 = vmatmul.mubr.msk.f32.gmra.mrb[6].mxu1 %vm448_vm0, %v431_v22 }
  0x27   : > { %2999 = vmatprep.mubr.msk.f32.mxu1 %vm448_vm0, %v432_v23 }
  0x28   : > { %2976 = vmatmul.mubr.msk.f32.gmra.mrb[8].mxu0 %vm448_vm0, %v417_v20 }
  0x29   : > { %2978 = vmatprep.mubr.msk.f32.mxu0 %vm448_vm0, %v418_v21 }
  0x2a   : > { %3000 = vmatmul.mubr.msk.f32.gmra.mrb[8].mxu1 %vm448_vm0, %v433_v26 }
  0x2b   : > { %3002 = vmatprep.mubr.msk.f32.mxu1 %vm448_vm0, %v434_v27 }
  0x2c   : > { %2979 = vmatmul.mubr.msk.f32.gmra.mrb[10].mxu0 %vm448_vm0, %v419_v24 }
  0x2d   : > { %2981 = vmatprep.mubr.msk.f32.mxu0 %vm448_vm0, %v420_v25 }
  0x2e   : > { %3003 = vmatmul.mubr.msk.f32.gmra.mrb[10].mxu1 %vm448_vm0, %v435_v30 }
  0x2f   : > { %3005 = vmatprep.mubr.msk.f32.mxu1 %vm448_vm0, %v436_v31 }
  0x30   : > { %2982 = vmatmul.mubr.msk.f32.gmra.mrb[12].mxu0 %vm448_vm0, %v421_v28 }
  0x31   : > { %2984 = vmatprep.mubr.msk.f32.mxu0 %vm448_vm0, %v422_v29 }
  0x32   : > { %3006 = vmatmul.mubr.msk.f32.gmra.mrb[12].mxu1 %vm448_vm0, %v437_v33 }
  0x33   : > { %3008 = vmatprep.mubr.msk.f32.mxu1 %vm448_vm0, %v438_v34 }
  0x34   : > { %2985 = vmatmul.mubr.msk.f32.gmra.mrb[14].mxu0 %vm448_vm0, %v423_v32 }
  0x36   : > { %3009 = vmatmul.mubr.msk.f32.gmra.mrb[14].mxu1 %vm448_vm0, %v439_v35 }
  0xeb   : > { %v2965_v43 = vpop.f32.mrb[0].mxu0 }
  0xec   : > { %v617_v44 = vadd.f32 %v2965_v43, %v3616_v42  ;;  %v611_v45 = vpop.f32.mrb[1].mxu0 }
  0xed   : > { %v612_v46 = vadd.f32 %v3616_v42, %v611_v45  ;;  %v3621_v52 = vpop.f32.mrb[0].mxu1 }
  0xee   : > { %v771_v49 = vmax.f32 %v617_v44, 0.0  ;;  %v691_v54 = vpop.f32.mrb[1].mxu1  ;;  %v697_v45 = vadd.f32 %v3621_v52, %v3616_v42 }
  0xef   : > { %v770_v47 = vmax.f32 %v612_v46, 0.0  ;;  %v2968_v48 = vpop.f32.mrb[2].mxu0  ;;  %v692_v33 = vadd.f32 %v3616_v42, %v691_v54 }
  0xf0   : > { %v627_v50 = vadd.f32 %v2968_v48, %v3616_v42  ;;  %v621_v51 = vpop.f32.mrb[3].mxu0 }
  0xf1   : > { %v622_v53 = vadd.f32 %v3616_v42, %v621_v51  ;;  %3015 = vmatprep.mubr.msk.f32.mxu1 %vm811_vm1, %v770_v47  ;;  %v3627_v60 = vpop.f32.mrb[2].mxu1  ;;  %v786_v41 = vmax.f32 %v692_v33, 0.0 }
  0xf2   : > { %3016 = vmatmul.mubr.msk.f32.vlgmr.msra.gmra.mrb[16].mxu1 %vm811_vm1, %v771_v49  ;;  %v773_v57 = vmax.f32 %v627_v50, 0.0  ;;  %v701_v62 = vpop.f32.mrb[3].mxu1  ;;  %v787_v50 = vmax.f32 %v697_v45, 0.0  ;;  %v707_v51 = vadd.f32 %v3627_v60, %v3616_v42 }
  0xf3   : > { %v772_v55 = vmax.f32 %v622_v53, 0.0  ;;  %v2971_v56 = vpop.f32.mrb[4].mxu0  ;;  %v702_v43 = vadd.f32 %v3616_v42, %v701_v62 }
  0xf4   : > { %v637_v58 = vadd.f32 %v2971_v56, %v3616_v42  ;;  %v631_v59 = vpop.f32.mrb[5].mxu0  ;;  %v789_v54 = vmax.f32 %v707_v51, 0.0 }
  0xf5   : > { %v632_v61 = vadd.f32 %v3616_v42, %v631_v59  ;;  %3018 = vmatprep.mubr.msk.f32.mxu1 %vm811_vm1, %v772_v55  ;;  %v3633_v4 = vpop.f32.mrb[4].mxu1  ;;  %v788_v48 = vmax.f32 %v702_v43, 0.0 }
  0xf6   : > { %3019 = vmatmul.mubr.msk.f32.gmra.mrb[18].mxu1 %vm811_vm1, %v773_v57  ;;  %v775_v1 = vmax.f32 %v637_v58, 0.0  ;;  %v711_v6 = vpop.f32.mrb[5].mxu1  ;;  %v717_v55 = vadd.f32 %v3633_v4, %v3616_v42 }
  0xf7   : > { %v774_v63 = vmax.f32 %v632_v61, 0.0  ;;  %v2974_v0 = vpop.f32.mrb[6].mxu0  ;;  %v712_v49 = vadd.f32 %v3616_v42, %v711_v6 }
  0xf8   : > { %v647_v2 = vadd.f32 %v2974_v0, %v3616_v42  ;;  %v641_v3 = vpop.f32.mrb[7].mxu0  ;;  %v791_v58 = vmax.f32 %v717_v55, 0.0 }
  0xf9   : > { %v642_v5 = vadd.f32 %v3616_v42, %v641_v3  ;;  %3021 = vmatprep.mubr.msk.f32.mxu1 %vm811_vm1, %v774_v63  ;;  %v2998_v12 = vpop.f32.mrb[6].mxu1  ;;  %v790_v53 = vmax.f32 %v712_v49, 0.0 }
  0xfa   : > { %3022 = vmatmul.mubr.msk.f32.gmra.mrb[20].mxu1 %vm811_vm1, %v775_v1  ;;  %v777_v9 = vmax.f32 %v647_v2, 0.0  ;;  %v721_v14 = vpop.f32.mrb[7].mxu1  ;;  %v727_v59 = vadd.f32 %v2998_v12, %v3616_v42  ;;  %v1530_v12 = vld [vmem:[%s4166_s7] sm:$0xff] }
  0xfb   : > { %v776_v7 = vmax.f32 %v642_v5, 0.0  ;;  %v2977_v8 = vpop.f32.mrb[8].mxu0  ;;  %v722_v52 = vadd.f32 %v3616_v42, %v721_v14  ;;  %v1532_v14 = vld [vmem:[%s4166_s7 + $0x10] sm:$0xff] }
  0xfc   : > { %v657_v10 = vadd.f32 %v2977_v8, %v3616_v42  ;;  %v651_v11 = vpop.f32.mrb[9].mxu0  ;;  %v793_v62 = vmax.f32 %v727_v59, 0.0 }
  0xfd   : > { %v652_v13 = vadd.f32 %v3616_v42, %v651_v11  ;;  %3024 = vmatprep.mubr.msk.f32.mxu1 %vm811_vm1, %v776_v7  ;;  %v3001_v20 = vpop.f32.mrb[8].mxu1  ;;  %v792_v56 = vmax.f32 %v722_v52, 0.0 }
  0xfe   : > { %3025 = vmatmul.mubr.msk.f32.gmra.mrb[22].mxu1 %vm811_vm1, %v777_v9  ;;  %v779_v17 = vmax.f32 %v657_v10, 0.0  ;;  %v731_v22 = vpop.f32.mrb[9].mxu1  ;;  %v737_v63 = vadd.f32 %v3001_v20, %v3616_v42 }
  0xff   : > { %v778_v15 = vmax.f32 %v652_v13, 0.0  ;;  %v2980_v16 = vpop.f32.mrb[10].mxu0  ;;  %v732_v57 = vadd.f32 %v3616_v42, %v731_v22  ;;  %v1531_v13 = vld [vmem:[%s4166_s7 + $0x8] sm:$0xff] }
 0x100   : > { %v667_v18 = vadd.f32 %v2980_v16, %v3616_v42  ;;  %v661_v19 = vpop.f32.mrb[11].mxu0  ;;  %v795_v2 = vmax.f32 %v737_v63, 0.0 }
 0x101   : > { %v662_v21 = vadd.f32 %v3616_v42, %v661_v19  ;;  %3027 = vmatprep.mubr.msk.f32.mxu1 %vm811_vm1, %v778_v15  ;;  %v3004_v28 = vpop.f32.mrb[10].mxu1  ;;  %v794_v60 = vmax.f32 %v732_v57, 0.0  ;;  %v1533_v15 = vld [vmem:[%s4166_s7 + $0x18] sm:$0xff] }
 0x102   : > { %3028 = vmatmul.mubr.msk.f32.gmra.mrb[24].mxu1 %vm811_vm1, %v779_v17  ;;  %v781_v25 = vmax.f32 %v667_v18, 0.0  ;;  %v741_v30 = vpop.f32.mrb[11].mxu1  ;;  %v747_v3 = vadd.f32 %v3004_v28, %v3616_v42  ;;  %v3243_v16 = vpack.c.bf16 %v1533_v15, %v1532_v14  ;;  %v3706_v17 = vld [vmem:[%s4163_s4] ss:$0 sm:$0xff] }
 0x103   : > { %v780_v23 = vmax.f32 %v662_v21, 0.0  ;;  %v2983_v24 = vpop.f32.mrb[12].mxu0  ;;  %v742_v61 = vadd.f32 %v3616_v42, %v741_v30 }
 0x104   : > { %v677_v26 = vadd.f32 %v2983_v24, %v3616_v42  ;;  %v671_v27 = vpop.f32.mrb[13].mxu0  ;;  %v797_v6 = vmax.f32 %v747_v3, 0.0 }
 0x105   : > { %v672_v29 = vadd.f32 %v3616_v42, %v671_v27  ;;  %3030 = vmatprep.mubr.msk.f32.mxu1 %vm811_vm1, %v780_v23  ;;  %v3007_v37 = vpop.f32.mrb[12].mxu1  ;;  %v796_v0 = vmax.f32 %v742_v61, 0.0 }
 0x106   : > { %3031 = vmatmul.mubr.msk.f32.gmra.mrb[26].mxu1 %vm811_vm1, %v781_v25  ;;  %v783_v34 = vmax.f32 %v677_v26, 0.0  ;;  %v751_v39 = vpop.f32.mrb[13].mxu1  ;;  %v757_v7 = vadd.f32 %v3007_v37, %v3616_v42 }
 0x107   : > { %v782_v31 = vmax.f32 %v672_v29, 0.0  ;;  %v2986_v32 = vpop.f32.mrb[14].mxu0  ;;  %v752_v1 = vadd.f32 %v3616_v42, %v751_v39 }
 0x108   : > { %v687_v35 = vadd.f32 %v2986_v32, %v3616_v42  ;;  %v681_v36 = vpop.f32.mrb[15].mxu0  ;;  %v799_v9 = vmax.f32 %v757_v7, 0.0 }
 0x109   : > { %v682_v38 = vadd.f32 %v3616_v42, %v681_v36  ;;  %3033 = vmatprep.mubr.msk.f32.mxu1 %vm811_vm1, %v782_v31  ;;  %v3010_v46 = vpop.f32.mrb[14].mxu1  ;;  %v798_v4 = vmax.f32 %v752_v1, 0.0 }
 0x10a   : > { %3034 = vmatmul.mubr.msk.f32.gmra.mrb[28].mxu1 %vm811_vm1, %v783_v34  ;;  %v785_v44 = vmax.f32 %v687_v35, 0.0  ;;  %v761_v47 = vpop.f32.mrb[15].mxu1  ;;  %v767_v10 = vadd.f32 %v3010_v46, %v3616_v42 }
 0x10b   : > { %v784_v40 = vmax.f32 %v682_v38, 0.0  ;;  %v762_v5 = vadd.f32 %v3616_v42, %v761_v47  ;;  %v3239_v42 = vpack.c.bf16 %v1531_v13, %v1530_v12 }
 0x10c   : > { %v801_v11 = vmax.f32 %v767_v10, 0.0 }
 0x10d   : > { %3036 = vmatprep.mubr.msk.f32.mxu1 %vm811_vm1, %v784_v40  ;;  %v800_v8 = vmax.f32 %v762_v5, 0.0  ;;  %3240 = vmatprep.subr.bf16.mxu1 %v3239_v42 }
 0x10e   : > { %3037 = vmatmul.mubr.msk.f32.gmra.mrb[30].mxu1 %vm811_vm1, %v785_v44 }
 0x10f   : > { %3039 = vmatprep.mubr.msk.f32.mxu1 %vm811_vm1, %v786_v41  ;;  %3242 = vmatpush3.bf16.msra.mxu1 %v3239_v42 }
 0x110   : > { %3244 = vmatprep.subr.bf16.mxu1 %v3243_v16 }
 0x112   : > { %3040 = vmatmul.mubr.msk.f32.gmra.mrb[32].mxu1 %vm811_vm1, %v787_v50 }
 0x113   : > { %3042 = vmatprep.mubr.msk.f32.mxu1 %vm811_vm1, %v788_v48  ;;  %3246 = vmatpush3.bf16.msra.mxu1 %v3243_v16 }
 0x116   : > { %3043 = vmatmul.mubr.msk.f32.gmra.mrb[34].mxu1 %vm811_vm1, %v789_v54 }
 0x117   : > { %3045 = vmatprep.mubr.msk.f32.mxu1 %vm811_vm1, %v790_v53 }
 0x11a   : > { %3046 = vmatmul.mubr.msk.f32.gmra.mrb[36].mxu1 %vm811_vm1, %v791_v58 }
 0x11b   : > { %3048 = vmatprep.mubr.msk.f32.mxu1 %vm811_vm1, %v792_v56 }
 0x11e   : > { %3049 = vmatmul.mubr.msk.f32.gmra.mrb[38].mxu1 %vm811_vm1, %v793_v62 }
 0x11f   : > { %3051 = vmatprep.mubr.msk.f32.mxu1 %vm811_vm1, %v794_v60 }
 0x122   : > { %3052 = vmatmul.mubr.msk.f32.gmra.mrb[40].mxu1 %vm811_vm1, %v795_v2 }
 0x123   : > { %3054 = vmatprep.mubr.msk.f32.mxu1 %vm811_vm1, %v796_v0 }
 0x126   : > { %3055 = vmatmul.mubr.msk.f32.gmra.mrb[42].mxu1 %vm811_vm1, %v797_v6 }
 0x127   : > { %3057 = vmatprep.mubr.msk.f32.mxu1 %vm811_vm1, %v798_v4 }
 0x12a   : > { %3058 = vmatmul.mubr.msk.f32.gmra.mrb[44].mxu1 %vm811_vm1, %v799_v9 }
 0x12b   : > { %3060 = vmatprep.mubr.msk.f32.mxu1 %vm811_vm1, %v800_v8 }
 0x12e   : > { %3061 = vmatmul.mubr.msk.f32.gmra.mrb[46].mxu1 %vm811_vm1, %v801_v11 }
 0x1c5   : > { %v3017_v18 = vpop.f32.mrb[16].mxu1 }
 0x1c6   : > { %v980_v19 = vadd.f32 %v3017_v18, %v3706_v17  ;;  %v974_v20 = vpop.f32.mrb[17].mxu1 }
 0x1c7   : > { %v975_v21 = vadd.f32 %v3706_v17, %v974_v20 }
 0x1c8   : > { %v1134_v24 = vmax.f32 %v980_v19, 0.0 }
 0x1c9   : > { %v1133_v22 = vmax.f32 %v975_v21, 0.0  ;;  %v3020_v23 = vpop.f32.mrb[18].mxu1 }
 0x1ca   : > { %v990_v25 = vadd.f32 %v3020_v23, %v3706_v17  ;;  %v984_v26 = vpop.f32.mrb[19].mxu1 }
 0x1cb   : > { %v985_v27 = vadd.f32 %v3706_v17, %v984_v26  ;;  %3071 = vmatprep.mubr.msk.f32.mxu0 %vm1176_vm2, %v1133_v22 }
 0x1cc   : > { %3072 = vmatmul.mubr.msk.f32.vlgmr.msra.gmra.mrb[16].mxu0 %vm1176_vm2, %v1134_v24  ;;  %v1136_v30 = vmax.f32 %v990_v25, 0.0 }
 0x1cd   : > { %v1135_v28 = vmax.f32 %v985_v27, 0.0  ;;  %v3023_v29 = vpop.f32.mrb[20].mxu1 }
 0x1ce   : > { %v1000_v31 = vadd.f32 %v3023_v29, %v3706_v17  ;;  %v994_v32 = vpop.f32.mrb[21].mxu1 }
 0x1cf   : > { %v995_v33 = vadd.f32 %v3706_v17, %v994_v32  ;;  %3074 = vmatprep.mubr.msk.f32.mxu0 %vm1176_vm2, %v1135_v28 }
 0x1d0   : > { %3075 = vmatmul.mubr.msk.f32.gmra.mrb[18].mxu0 %vm1176_vm2, %v1136_v30  ;;  %v1138_v36 = vmax.f32 %v1000_v31, 0.0 }
 0x1d1   : > { %v1137_v34 = vmax.f32 %v995_v33, 0.0  ;;  %v3026_v35 = vpop.f32.mrb[22].mxu1 }
 0x1d2   : > { %v1010_v37 = vadd.f32 %v3026_v35, %v3706_v17  ;;  %v1004_v38 = vpop.f32.mrb[23].mxu1 }
 0x1d3   : > { %v1005_v39 = vadd.f32 %v3706_v17, %v1004_v38  ;;  %3077 = vmatprep.mubr.msk.f32.mxu0 %vm1176_vm2, %v1137_v34 }
 0x1d4   : > { %3078 = vmatmul.mubr.msk.f32.gmra.mrb[20].mxu0 %vm1176_vm2, %v1138_v36  ;;  %v1140_v43 = vmax.f32 %v1010_v37, 0.0 }
 0x1d5   : > { %v1139_v40 = vmax.f32 %v1005_v39, 0.0  ;;  %v3029_v41 = vpop.f32.mrb[24].mxu1 }
 0x1d6   : > { %v1020_v44 = vadd.f32 %v3029_v41, %v3706_v17  ;;  %v1014_v45 = vpop.f32.mrb[25].mxu1 }
 0x1d7   : > { %v1015_v46 = vadd.f32 %v3706_v17, %v1014_v45  ;;  %3080 = vmatprep.mubr.msk.f32.mxu0 %vm1176_vm2, %v1139_v40 }
 0x1d8   : > { %3081 = vmatmul.mubr.msk.f32.gmra.mrb[22].mxu0 %vm1176_vm2, %v1140_v43  ;;  %v1142_v49 = vmax.f32 %v1020_v44, 0.0 }
 0x1d9   : > { %v1141_v47 = vmax.f32 %v1015_v46, 0.0  ;;  %v3032_v48 = vpop.f32.mrb[26].mxu1 }
 0x1da   : > { %v1030_v50 = vadd.f32 %v3032_v48, %v3706_v17  ;;  %v1024_v51 = vpop.f32.mrb[27].mxu1 }
 0x1db   : > { %v1025_v53 = vadd.f32 %v3706_v17, %v1024_v51  ;;  %3083 = vmatprep.mubr.msk.f32.mxu0 %vm1176_vm2, %v1141_v47 }
 0x1dc   : > { %3084 = vmatmul.mubr.msk.f32.gmra.mrb[24].mxu0 %vm1176_vm2, %v1142_v49  ;;  %v1144_v55 = vmax.f32 %v1030_v50, 0.0 }
 0x1dd   : > { %v1143_v52 = vmax.f32 %v1025_v53, 0.0  ;;  %v3035_v54 = vpop.f32.mrb[28].mxu1  ;;  %v1894_v53 = vld [vmem:[%s4168_s9] sm:$0xff] }
 0x1de   : > { %v1040_v56 = vadd.f32 %v3035_v54, %v3706_v17  ;;  %v1034_v57 = vpop.f32.mrb[29].mxu1 }
 0x1df   : > { %v1035_v58 = vadd.f32 %v3706_v17, %v1034_v57  ;;  %3086 = vmatprep.mubr.msk.f32.mxu0 %vm1176_vm2, %v1143_v52  ;;  %v1895_v52 = vld [vmem:[%s4168_s9 + $0x8] sm:$0xff] }
 0x1e0   : > { %3087 = vmatmul.mubr.msk.f32.gmra.mrb[26].mxu0 %vm1176_vm2, %v1144_v55  ;;  %v1146_v61 = vmax.f32 %v1040_v56, 0.0  ;;  %v3247_v54 = vpack.c.bf16 %v1895_v52, %v1894_v53 }
 0x1e1   : > { %v1145_v59 = vmax.f32 %v1035_v58, 0.0  ;;  %v3038_v60 = vpop.f32.mrb[30].mxu1 }
 0x1e2   : > { %v1050_v62 = vadd.f32 %v3038_v60, %v3706_v17  ;;  %v1044_v63 = vpop.f32.mrb[31].mxu1  ;;  %3248 = vmatprep.subr.bf16.mxu0 %v3247_v54 }
 0x1e3   : > { %v1045_v0 = vadd.f32 %v3706_v17, %v1044_v63  ;;  %3089 = vmatprep.mubr.msk.f32.mxu0 %vm1176_vm2, %v1145_v59  ;;  %3250 = vmatpush3.bf16.msra.mxu0 %v3247_v54 }
 0x1e4   : > { %3090 = vmatmul.mubr.msk.f32.gmra.mrb[28].mxu0 %vm1176_vm2, %v1146_v61  ;;  %v1148_v3 = vmax.f32 %v1050_v62, 0.0 }
 0x1e5   : > { %v1147_v1 = vmax.f32 %v1045_v0, 0.0  ;;  %v3041_v2 = vpop.f32.mrb[32].mxu1 }
 0x1e6   : > { %v1060_v4 = vadd.f32 %v3041_v2, %v3706_v17  ;;  %v1054_v5 = vpop.f32.mrb[33].mxu1 }
 0x1e7   : > { %v1055_v6 = vadd.f32 %v3706_v17, %v1054_v5  ;;  %3092 = vmatprep.mubr.msk.f32.mxu0 %vm1176_vm2, %v1147_v1 }
 0x1e8   : > { %3093 = vmatmul.mubr.msk.f32.gmra.mrb[30].mxu0 %vm1176_vm2, %v1148_v3  ;;  %v1150_v9 = vmax.f32 %v1060_v4, 0.0 }
 0x1e9   : > { %v1149_v7 = vmax.f32 %v1055_v6, 0.0  ;;  %v3044_v8 = vpop.f32.mrb[34].mxu1 }
 0x1ea   : > { %v1070_v10 = vadd.f32 %v3044_v8, %v3706_v17  ;;  %v1064_v11 = vpop.f32.mrb[35].mxu1 }
 0x1eb   : > { %v1065_v12 = vadd.f32 %v3706_v17, %v1064_v11  ;;  %3095 = vmatprep.mubr.msk.f32.mxu0 %vm1176_vm2, %v1149_v7 }
 0x1ec   : > { %3096 = vmatmul.mubr.msk.f32.gmra.mrb[32].mxu0 %vm1176_vm2, %v1150_v9  ;;  %v1152_v42 = vmax.f32 %v1070_v10, 0.0 }
 0x1ed   : > { %v1151_v13 = vmax.f32 %v1065_v12, 0.0  ;;  %v3047_v14 = vpop.f32.mrb[36].mxu1 }
 0x1ee   : > { %v1080_v15 = vadd.f32 %v3047_v14, %v3706_v17  ;;  %v1074_v16 = vpop.f32.mrb[37].mxu1 }
 0x1ef   : > { %v1075_v18 = vadd.f32 %v3706_v17, %v1074_v16  ;;  %3098 = vmatprep.mubr.msk.f32.mxu0 %vm1176_vm2, %v1151_v13 }
 0x1f0   : > { %3099 = vmatmul.mubr.msk.f32.gmra.mrb[34].mxu0 %vm1176_vm2, %v1152_v42  ;;  %v1154_v21 = vmax.f32 %v1080_v15, 0.0 }
 0x1f1   : > { %v1153_v19 = vmax.f32 %v1075_v18, 0.0  ;;  %v3050_v20 = vpop.f32.mrb[38].mxu1 }
 0x1f2   : > { %v1090_v22 = vadd.f32 %v3050_v20, %v3706_v17  ;;  %v1084_v23 = vpop.f32.mrb[39].mxu1 }
 0x1f3   : > { %v1085_v24 = vadd.f32 %v3706_v17, %v1084_v23  ;;  %3101 = vmatprep.mubr.msk.f32.mxu0 %vm1176_vm2, %v1153_v19 }
 0x1f4   : > { %3102 = vmatmul.mubr.msk.f32.gmra.mrb[36].mxu0 %vm1176_vm2, %v1154_v21  ;;  %v1156_v27 = vmax.f32 %v1090_v22, 0.0 }
 0x1f5   : > { %v1155_v25 = vmax.f32 %v1085_v24, 0.0  ;;  %v3053_v26 = vpop.f32.mrb[40].mxu1 }
 0x1f6   : > { %v1100_v28 = vadd.f32 %v3053_v26, %v3706_v17  ;;  %v1094_v29 = vpop.f32.mrb[41].mxu1 }
 0x1f7   : > { %v1095_v30 = vadd.f32 %v3706_v17, %v1094_v29  ;;  %3104 = vmatprep.mubr.msk.f32.mxu0 %vm1176_vm2, %v1155_v25 }
 0x1f8   : > { %3105 = vmatmul.mubr.msk.f32.gmra.mrb[38].mxu0 %vm1176_vm2, %v1156_v27  ;;  %v1158_v33 = vmax.f32 %v1100_v28, 0.0 }
 0x1f9   : > { %v1157_v31 = vmax.f32 %v1095_v30, 0.0  ;;  %v3056_v32 = vpop.f32.mrb[42].mxu1 }
 0x1fa   : > { %v1110_v34 = vadd.f32 %v3056_v32, %v3706_v17  ;;  %v1104_v35 = vpop.f32.mrb[43].mxu1 }
 0x1fb   : > { %v1105_v36 = vadd.f32 %v3706_v17, %v1104_v35  ;;  %3107 = vmatprep.mubr.msk.f32.mxu0 %vm1176_vm2, %v1157_v31 }
 0x1fc   : > { %3108 = vmatmul.mubr.msk.f32.gmra.mrb[40].mxu0 %vm1176_vm2, %v1158_v33  ;;  %v1160_v39 = vmax.f32 %v1110_v34, 0.0 }
 0x1fd   : > { %v1159_v37 = vmax.f32 %v1105_v36, 0.0  ;;  %v3059_v38 = vpop.f32.mrb[44].mxu1 }
 0x1fe   : > { %v1120_v40 = vadd.f32 %v3059_v38, %v3706_v17  ;;  %v1114_v41 = vpop.f32.mrb[45].mxu1 }
 0x1ff   : > { %v1115_v43 = vadd.f32 %v3706_v17, %v1114_v41  ;;  %3110 = vmatprep.mubr.msk.f32.mxu0 %vm1176_vm2, %v1159_v37 }
 0x200   : > { %3111 = vmatmul.mubr.msk.f32.gmra.mrb[42].mxu0 %vm1176_vm2, %v1160_v39  ;;  %v1162_v46 = vmax.f32 %v1120_v40, 0.0 }
 0x201   : > { %v1161_v44 = vmax.f32 %v1115_v43, 0.0  ;;  %v3062_v45 = vpop.f32.mrb[46].mxu1 }
 0x202   : > { %v1130_v47 = vadd.f32 %v3062_v45, %v3706_v17  ;;  %v1124_v48 = vpop.f32.mrb[47].mxu1 }
 0x203   : > { %v1125_v49 = vadd.f32 %v3706_v17, %v1124_v48  ;;  %3113 = vmatprep.mubr.msk.f32.mxu0 %vm1176_vm2, %v1161_v44  ;;  %v3781_v17 = vld [vmem:[%s4165_s6] ss:$0 sm:$0xff] }
 0x204   : > { %3114 = vmatmul.mubr.msk.f32.gmra.mrb[44].mxu0 %vm1176_vm2, %v1162_v46  ;;  %v1164_v51 = vmax.f32 %v1130_v47, 0.0 }
 0x205   : > { %v1163_v50 = vmax.f32 %v1125_v49, 0.0 }
 0x207   : > { %3116 = vmatprep.mubr.msk.f32.mxu0 %vm1176_vm2, %v1163_v50 }
 0x208   : > { %3117 = vmatmul.mubr.msk.f32.gmra.mrb[46].mxu0 %vm1176_vm2, %v1164_v51 }
 0x29f   : > { %v3073_v55 = vpop.f32.mrb[16].mxu0 }
 0x2a0   : > { %v1345_v56 = vadd.f32 %v3073_v55, %v3781_v17  ;;  %v1339_v57 = vpop.f32.mrb[17].mxu0 }
 0x2a1   : > { %v1340_v58 = vadd.f32 %v3781_v17, %v1339_v57 }
 0x2a2   : > { %v1499_v61 = vmax.f32 %v1345_v56, 0.0 }
 0x2a3   : > { %v1498_v59 = vmax.f32 %v1340_v58, 0.0  ;;  %v3076_v60 = vpop.f32.mrb[18].mxu0 }
 0x2a4   : > { %v1355_v62 = vadd.f32 %v3076_v60, %v3781_v17  ;;  %v1349_v63 = vpop.f32.mrb[19].mxu0 }
 0x2a5   : > { %v1350_v0 = vadd.f32 %v3781_v17, %v1349_v63  ;;  %3127 = vmatprep.mubr.msk.f32.mxu1 %vm1176_vm2, %v1498_v59 }
 0x2a6   : > { %3128 = vmatmul.mubr.msk.f32.vlgmr.msra.gmra.mrb[48].mxu1 %vm1176_vm2, %v1499_v61  ;;  %v1501_v3 = vmax.f32 %v1355_v62, 0.0 }
 0x2a7   : > { %v1500_v1 = vmax.f32 %v1350_v0, 0.0  ;;  %v3079_v2 = vpop.f32.mrb[20].mxu0 }
 0x2a8   : > { %v1365_v4 = vadd.f32 %v3079_v2, %v3781_v17  ;;  %v1359_v5 = vpop.f32.mrb[21].mxu0 }
 0x2a9   : > { %v1360_v6 = vadd.f32 %v3781_v17, %v1359_v5  ;;  %3130 = vmatprep.mubr.msk.f32.mxu1 %vm1176_vm2, %v1500_v1 }
 0x2aa   : > { %3131 = vmatmul.mubr.msk.f32.gmra.mrb[50].mxu1 %vm1176_vm2, %v1501_v3  ;;  %v1503_v9 = vmax.f32 %v1365_v4, 0.0 }
 0x2ab   : > { %v1502_v7 = vmax.f32 %v1360_v6, 0.0  ;;  %v3082_v8 = vpop.f32.mrb[22].mxu0 }
 0x2ac   : > { %v1375_v10 = vadd.f32 %v3082_v8, %v3781_v17  ;;  %v1369_v11 = vpop.f32.mrb[23].mxu0 }
 0x2ad   : > { %v1370_v12 = vadd.f32 %v3781_v17, %v1369_v11  ;;  %3133 = vmatprep.mubr.msk.f32.mxu1 %vm1176_vm2, %v1502_v7 }
 0x2ae   : > { %3134 = vmatmul.mubr.msk.f32.gmra.mrb[52].mxu1 %vm1176_vm2, %v1503_v9  ;;  %v1505_v42 = vmax.f32 %v1375_v10, 0.0 }
 0x2af   : > { %v1504_v13 = vmax.f32 %v1370_v12, 0.0  ;;  %v3085_v14 = vpop.f32.mrb[24].mxu0 }
 0x2b0   : > { %v1385_v15 = vadd.f32 %v3085_v14, %v3781_v17  ;;  %v1379_v16 = vpop.f32.mrb[25].mxu0 }
 0x2b1   : > { %v1380_v18 = vadd.f32 %v3781_v17, %v1379_v16  ;;  %3136 = vmatprep.mubr.msk.f32.mxu1 %vm1176_vm2, %v1504_v13 }
 0x2b2   : > { %3137 = vmatmul.mubr.msk.f32.gmra.mrb[54].mxu1 %vm1176_vm2, %v1505_v42  ;;  %v1507_v21 = vmax.f32 %v1385_v15, 0.0 }
 0x2b3   : > { %v1506_v19 = vmax.f32 %v1380_v18, 0.0  ;;  %v3088_v20 = vpop.f32.mrb[26].mxu0 }
 0x2b4   : > { %v1395_v22 = vadd.f32 %v3088_v20, %v3781_v17  ;;  %v1389_v23 = vpop.f32.mrb[27].mxu0 }
 0x2b5   : > { %v1390_v24 = vadd.f32 %v3781_v17, %v1389_v23  ;;  %3139 = vmatprep.mubr.msk.f32.mxu1 %vm1176_vm2, %v1506_v19 }
 0x2b6   : > { %3140 = vmatmul.mubr.msk.f32.gmra.mrb[56].mxu1 %vm1176_vm2, %v1507_v21  ;;  %v1509_v27 = vmax.f32 %v1395_v22, 0.0 }
 0x2b7   : > { %v1508_v25 = vmax.f32 %v1390_v24, 0.0  ;;  %v3091_v26 = vpop.f32.mrb[28].mxu0  ;;  %v3850_v24 = vld [vmem:[%s4167_s8] ss:$0 sm:$0xff] }
 0x2b8   : > { %v1405_v28 = vadd.f32 %v3091_v26, %v3781_v17  ;;  %v1399_v29 = vpop.f32.mrb[29].mxu0 }
 0x2b9   : > { %v1400_v30 = vadd.f32 %v3781_v17, %v1399_v29  ;;  %3142 = vmatprep.mubr.msk.f32.mxu1 %vm1176_vm2, %v1508_v25 }
 0x2ba   : > { %3143 = vmatmul.mubr.msk.f32.gmra.mrb[58].mxu1 %vm1176_vm2, %v1509_v27  ;;  %v1511_v33 = vmax.f32 %v1405_v28, 0.0 }
 0x2bb   : > { %v1510_v31 = vmax.f32 %v1400_v30, 0.0  ;;  %v3094_v32 = vpop.f32.mrb[30].mxu0 }
 0x2bc   : > { %v1415_v34 = vadd.f32 %v3094_v32, %v3781_v17  ;;  %v1409_v35 = vpop.f32.mrb[31].mxu0 }
 0x2bd   : > { %v1410_v36 = vadd.f32 %v3781_v17, %v1409_v35  ;;  %3145 = vmatprep.mubr.msk.f32.mxu1 %vm1176_vm2, %v1510_v31 }
 0x2be   : > { %3146 = vmatmul.mubr.msk.f32.gmra.mrb[60].mxu1 %vm1176_vm2, %v1511_v33  ;;  %v1513_v39 = vmax.f32 %v1415_v34, 0.0 }
 0x2bf   : > { %v1512_v37 = vmax.f32 %v1410_v36, 0.0  ;;  %v3097_v38 = vpop.f32.mrb[32].mxu0 }
 0x2c0   : > { %v1425_v40 = vadd.f32 %v3097_v38, %v3781_v17  ;;  %v1419_v41 = vpop.f32.mrb[33].mxu0 }
 0x2c1   : > { %v1420_v43 = vadd.f32 %v3781_v17, %v1419_v41  ;;  %3148 = vmatprep.mubr.msk.f32.mxu1 %vm1176_vm2, %v1512_v37 }
 0x2c2   : > { %3149 = vmatmul.mubr.msk.f32.gmra.mrb[62].mxu1 %vm1176_vm2, %v1513_v39  ;;  %v1515_v46 = vmax.f32 %v1425_v40, 0.0 }
 0x2c3   : > { %v1514_v44 = vmax.f32 %v1420_v43, 0.0  ;;  %v3100_v45 = vpop.f32.mrb[34].mxu0 }
 0x2c4   : > { %v1435_v47 = vadd.f32 %v3100_v45, %v3781_v17  ;;  %v1429_v48 = vpop.f32.mrb[35].mxu0 }
 0x2c5   : > { %v1430_v49 = vadd.f32 %v3781_v17, %v1429_v48  ;;  %3151 = vmatprep.mubr.msk.f32.mxu1 %vm1176_vm2, %v1514_v44 }
 0x2c6   : > { %3152 = vmatmul.mubr.msk.f32.gmra.mrb[64].mxu1 %vm1176_vm2, %v1515_v46  ;;  %v1517_v53 = vmax.f32 %v1435_v47, 0.0 }
 0x2c7   : > { %v1516_v50 = vmax.f32 %v1430_v49, 0.0  ;;  %v3103_v51 = vpop.f32.mrb[36].mxu0 }
 0x2c8   : > { %v1445_v52 = vadd.f32 %v3103_v51, %v3781_v17  ;;  %v1439_v54 = vpop.f32.mrb[37].mxu0 }
 0x2c9   : > { %v1440_v55 = vadd.f32 %v3781_v17, %v1439_v54  ;;  %3154 = vmatprep.mubr.msk.f32.mxu1 %vm1176_vm2, %v1516_v50 }
 0x2ca   : > { %3155 = vmatmul.mubr.msk.f32.gmra.mrb[66].mxu1 %vm1176_vm2, %v1517_v53  ;;  %v1519_v58 = vmax.f32 %v1445_v52, 0.0 }
 0x2cb   : > { %v1518_v56 = vmax.f32 %v1440_v55, 0.0  ;;  %v3106_v57 = vpop.f32.mrb[38].mxu0 }
 0x2cc   : > { %v1455_v59 = vadd.f32 %v3106_v57, %v3781_v17  ;;  %v1449_v60 = vpop.f32.mrb[39].mxu0 }
 0x2cd   : > { %v1450_v61 = vadd.f32 %v3781_v17, %v1449_v60  ;;  %3157 = vmatprep.mubr.msk.f32.mxu1 %vm1176_vm2, %v1518_v56 }
 0x2ce   : > { %3158 = vmatmul.mubr.msk.f32.gmra.mrb[68].mxu1 %vm1176_vm2, %v1519_v58  ;;  %v1521_v0 = vmax.f32 %v1455_v59, 0.0 }
 0x2cf   : > { %v1520_v62 = vmax.f32 %v1450_v61, 0.0  ;;  %v3109_v63 = vpop.f32.mrb[40].mxu0 }
 0x2d0   : > { %v1465_v1 = vadd.f32 %v3109_v63, %v3781_v17  ;;  %v1459_v2 = vpop.f32.mrb[41].mxu0 }
 0x2d1   : > { %v1460_v3 = vadd.f32 %v3781_v17, %v1459_v2  ;;  %3160 = vmatprep.mubr.msk.f32.mxu1 %vm1176_vm2, %v1520_v62 }
 0x2d2   : > { %3161 = vmatmul.mubr.msk.f32.gmra.mrb[70].mxu1 %vm1176_vm2, %v1521_v0  ;;  %v1523_v6 = vmax.f32 %v1465_v1, 0.0 }
 0x2d3   : > { %v1522_v4 = vmax.f32 %v1460_v3, 0.0  ;;  %v3112_v5 = vpop.f32.mrb[42].mxu0 }
 0x2d4   : > { %v1475_v7 = vadd.f32 %v3112_v5, %v3781_v17  ;;  %v1469_v8 = vpop.f32.mrb[43].mxu0 }
 0x2d5   : > { %v1470_v9 = vadd.f32 %v3781_v17, %v1469_v8  ;;  %3163 = vmatprep.mubr.msk.f32.mxu1 %vm1176_vm2, %v1522_v4 }
 0x2d6   : > { %3164 = vmatmul.mubr.msk.f32.gmra.mrb[72].mxu1 %vm1176_vm2, %v1523_v6  ;;  %v1525_v12 = vmax.f32 %v1475_v7, 0.0 }
 0x2d7   : > { %v1524_v10 = vmax.f32 %v1470_v9, 0.0  ;;  %v3115_v11 = vpop.f32.mrb[44].mxu0 }
 0x2d8   : > { %v1485_v13 = vadd.f32 %v3115_v11, %v3781_v17  ;;  %v1479_v14 = vpop.f32.mrb[45].mxu0 }
 0x2d9   : > { %v1480_v42 = vadd.f32 %v3781_v17, %v1479_v14  ;;  %3166 = vmatprep.mubr.msk.f32.mxu1 %vm1176_vm2, %v1524_v10 }
 0x2da   : > { %3167 = vmatmul.mubr.msk.f32.gmra.mrb[74].mxu1 %vm1176_vm2, %v1525_v12  ;;  %v1527_v18 = vmax.f32 %v1485_v13, 0.0 }
 0x2db   : > { %v1526_v15 = vmax.f32 %v1480_v42, 0.0  ;;  %v3118_v16 = vpop.f32.mrb[46].mxu0 }
 0x2dc   : > { %v1495_v19 = vadd.f32 %v3118_v16, %v3781_v17  ;;  %v1489_v20 = vpop.f32.mrb[47].mxu0 }
 0x2dd   : > { %v1490_v21 = vadd.f32 %v3781_v17, %v1489_v20  ;;  %3169 = vmatprep.mubr.msk.f32.mxu1 %vm1176_vm2, %v1526_v15 }
 0x2de   : > { %3170 = vmatmul.mubr.msk.f32.gmra.mrb[76].mxu1 %vm1176_vm2, %v1527_v18  ;;  %v1529_v23 = vmax.f32 %v1495_v19, 0.0 }
 0x2df   : > { %v1528_v22 = vmax.f32 %v1490_v21, 0.0 }
 0x2e1   : > { %3172 = vmatprep.mubr.msk.f32.mxu1 %vm1176_vm2, %v1528_v22 }
 0x2e2   : > { %3173 = vmatmul.mubr.msk.f32.gmra.mrb[78].mxu1 %vm1176_vm2, %v1529_v23 }
 0x379   : > { %v3129_v25 = vpop.f32.mrb[48].mxu1 }
 0x37a   : > { %v1709_v26 = vadd.f32 %v3129_v25, %v3850_v24  ;;  %v1703_v27 = vpop.f32.mrb[49].mxu1 }
 0x37b   : > { %v1704_v17 = vadd.f32 %v3850_v24, %v1703_v27 }
 0x37c   : > { %v1863_v30 = vmax.f32 %v1709_v26, 0.0 }
 0x37d   : > { %v1862_v28 = vmax.f32 %v1704_v17, 0.0  ;;  %v3132_v29 = vpop.f32.mrb[50].mxu1 }
 0x37e   : > { %v1719_v31 = vadd.f32 %v3132_v29, %v3850_v24  ;;  %v1713_v32 = vpop.f32.mrb[51].mxu1 }
 0x37f   : > { %v1714_v33 = vadd.f32 %v3850_v24, %v1713_v32  ;;  %3179 = vmatprep.mubr.msk.f32.mxu0 %vm811_vm1, %v1862_v28 }
 0x380   : > { %3180 = vmatmul.mubr.msk.f32.vlgmr.msra.gmra.mrb[48].mxu0 %vm811_vm1, %v1863_v30  ;;  %v1865_v36 = vmax.f32 %v1719_v31, 0.0 }
 0x381   : > { %v1864_v34 = vmax.f32 %v1714_v33, 0.0  ;;  %v3135_v35 = vpop.f32.mrb[52].mxu1 }
 0x382   : > { %v1729_v37 = vadd.f32 %v3135_v35, %v3850_v24  ;;  %v1723_v38 = vpop.f32.mrb[53].mxu1 }
 0x383   : > { %v1724_v39 = vadd.f32 %v3850_v24, %v1723_v38  ;;  %3182 = vmatprep.mubr.msk.f32.mxu0 %vm811_vm1, %v1864_v34 }
 0x384   : > { %3183 = vmatmul.mubr.msk.f32.gmra.mrb[50].mxu0 %vm811_vm1, %v1865_v36  ;;  %v1867_v43 = vmax.f32 %v1729_v37, 0.0 }
 0x385   : > { %v1866_v40 = vmax.f32 %v1724_v39, 0.0  ;;  %v3138_v41 = vpop.f32.mrb[54].mxu1 }
 0x386   : > { %v1739_v44 = vadd.f32 %v3138_v41, %v3850_v24  ;;  %v1733_v45 = vpop.f32.mrb[55].mxu1 }
 0x387   : > { %v1734_v46 = vadd.f32 %v3850_v24, %v1733_v45  ;;  %3185 = vmatprep.mubr.msk.f32.mxu0 %vm811_vm1, %v1866_v40 }
 0x388   : > { %3186 = vmatmul.mubr.msk.f32.gmra.mrb[52].mxu0 %vm811_vm1, %v1867_v43  ;;  %v1869_v49 = vmax.f32 %v1739_v44, 0.0 }
 0x389   : > { %v1868_v47 = vmax.f32 %v1734_v46, 0.0  ;;  %v3141_v48 = vpop.f32.mrb[56].mxu1 }
 0x38a   : > { %v1749_v50 = vadd.f32 %v3141_v48, %v3850_v24  ;;  %v1743_v51 = vpop.f32.mrb[57].mxu1 }
 0x38b   : > { %v1744_v53 = vadd.f32 %v3850_v24, %v1743_v51  ;;  %3188 = vmatprep.mubr.msk.f32.mxu0 %vm811_vm1, %v1868_v47 }
 0x38c   : > { %3189 = vmatmul.mubr.msk.f32.gmra.mrb[54].mxu0 %vm811_vm1, %v1869_v49  ;;  %v1871_v55 = vmax.f32 %v1749_v50, 0.0 }
 0x38d   : > { %v1870_v52 = vmax.f32 %v1744_v53, 0.0  ;;  %v3144_v54 = vpop.f32.mrb[58].mxu1 }
 0x38e   : > { %v1759_v56 = vadd.f32 %v3144_v54, %v3850_v24  ;;  %v1753_v57 = vpop.f32.mrb[59].mxu1 }
 0x38f   : > { %v1754_v58 = vadd.f32 %v3850_v24, %v1753_v57  ;;  %3191 = vmatprep.mubr.msk.f32.mxu0 %vm811_vm1, %v1870_v52 }
 0x390   : > { %3192 = vmatmul.mubr.msk.f32.gmra.mrb[56].mxu0 %vm811_vm1, %v1871_v55  ;;  %v1873_v61 = vmax.f32 %v1759_v56, 0.0 }
 0x391   : > { %v1872_v59 = vmax.f32 %v1754_v58, 0.0  ;;  %v3147_v60 = vpop.f32.mrb[60].mxu1  ;;  %v3920_v58 = vld [vmem:[%s4169_s10] ss:$0 sm:$0xff] }
 0x392   : > { %v1769_v62 = vadd.f32 %v3147_v60, %v3850_v24  ;;  %v1763_v63 = vpop.f32.mrb[61].mxu1 }
 0x393   : > { %v1764_v0 = vadd.f32 %v3850_v24, %v1763_v63  ;;  %3194 = vmatprep.mubr.msk.f32.mxu0 %vm811_vm1, %v1872_v59 }
 0x394   : > { %3195 = vmatmul.mubr.msk.f32.gmra.mrb[58].mxu0 %vm811_vm1, %v1873_v61  ;;  %v1875_v3 = vmax.f32 %v1769_v62, 0.0 }
 0x395   : > { %v1874_v1 = vmax.f32 %v1764_v0, 0.0  ;;  %v3150_v2 = vpop.f32.mrb[62].mxu1 }
 0x396   : > { %v1779_v4 = vadd.f32 %v3150_v2, %v3850_v24  ;;  %v1773_v5 = vpop.f32.mrb[63].mxu1 }
 0x397   : > { %v1774_v6 = vadd.f32 %v3850_v24, %v1773_v5  ;;  %3197 = vmatprep.mubr.msk.f32.mxu0 %vm811_vm1, %v1874_v1 }
 0x398   : > { %3198 = vmatmul.mubr.msk.f32.gmra.mrb[60].mxu0 %vm811_vm1, %v1875_v3  ;;  %v1877_v9 = vmax.f32 %v1779_v4, 0.0 }
 0x399   : > { %v1876_v7 = vmax.f32 %v1774_v6, 0.0  ;;  %v3153_v8 = vpop.f32.mrb[64].mxu1 }
 0x39a   : > { %v1789_v10 = vadd.f32 %v3153_v8, %v3850_v24  ;;  %v1783_v11 = vpop.f32.mrb[65].mxu1 }
 0x39b   : > { %v1784_v12 = vadd.f32 %v3850_v24, %v1783_v11  ;;  %3200 = vmatprep.mubr.msk.f32.mxu0 %vm811_vm1, %v1876_v7 }
 0x39c   : > { %3201 = vmatmul.mubr.msk.f32.gmra.mrb[62].mxu0 %vm811_vm1, %v1877_v9  ;;  %v1879_v42 = vmax.f32 %v1789_v10, 0.0 }
 0x39d   : > { %v1878_v13 = vmax.f32 %v1784_v12, 0.0  ;;  %v3156_v14 = vpop.f32.mrb[66].mxu1 }
 0x39e   : > { %v1799_v15 = vadd.f32 %v3156_v14, %v3850_v24  ;;  %v1793_v16 = vpop.f32.mrb[67].mxu1 }
 0x39f   : > { %v1794_v18 = vadd.f32 %v3850_v24, %v1793_v16  ;;  %3203 = vmatprep.mubr.msk.f32.mxu0 %vm811_vm1, %v1878_v13 }
 0x3a0   : > { %3204 = vmatmul.mubr.msk.f32.gmra.mrb[64].mxu0 %vm811_vm1, %v1879_v42  ;;  %v1881_v21 = vmax.f32 %v1799_v15, 0.0 }
 0x3a1   : > { %v1880_v19 = vmax.f32 %v1794_v18, 0.0  ;;  %v3159_v20 = vpop.f32.mrb[68].mxu1 }
 0x3a2   : > { %v1809_v22 = vadd.f32 %v3159_v20, %v3850_v24  ;;  %v1803_v23 = vpop.f32.mrb[69].mxu1 }
 0x3a3   : > { %v1804_v25 = vadd.f32 %v3850_v24, %v1803_v23  ;;  %3206 = vmatprep.mubr.msk.f32.mxu0 %vm811_vm1, %v1880_v19 }
 0x3a4   : > { %3207 = vmatmul.mubr.msk.f32.gmra.mrb[66].mxu0 %vm811_vm1, %v1881_v21  ;;  %v1883_v17 = vmax.f32 %v1809_v22, 0.0 }
 0x3a5   : > { %v1882_v26 = vmax.f32 %v1804_v25, 0.0  ;;  %v3162_v27 = vpop.f32.mrb[70].mxu1 }
 0x3a6   : > { %v1819_v28 = vadd.f32 %v3162_v27, %v3850_v24  ;;  %v1813_v29 = vpop.f32.mrb[71].mxu1 }
 0x3a7   : > { %v1814_v30 = vadd.f32 %v3850_v24, %v1813_v29  ;;  %3209 = vmatprep.mubr.msk.f32.mxu0 %vm811_vm1, %v1882_v26 }
 0x3a8   : > { %3210 = vmatmul.mubr.msk.f32.gmra.mrb[68].mxu0 %vm811_vm1, %v1883_v17  ;;  %v1885_v33 = vmax.f32 %v1819_v28, 0.0 }
 0x3a9   : > { %v1884_v31 = vmax.f32 %v1814_v30, 0.0  ;;  %v3165_v32 = vpop.f32.mrb[72].mxu1 }
 0x3aa   : > { %v1829_v34 = vadd.f32 %v3165_v32, %v3850_v24  ;;  %v1823_v35 = vpop.f32.mrb[73].mxu1 }
 0x3ab   : > { %v1824_v36 = vadd.f32 %v3850_v24, %v1823_v35  ;;  %3212 = vmatprep.mubr.msk.f32.mxu0 %vm811_vm1, %v1884_v31 }
 0x3ac   : > { %3213 = vmatmul.mubr.msk.f32.gmra.mrb[70].mxu0 %vm811_vm1, %v1885_v33  ;;  %v1887_v39 = vmax.f32 %v1829_v34, 0.0 }
 0x3ad   : > { %v1886_v37 = vmax.f32 %v1824_v36, 0.0  ;;  %v3168_v38 = vpop.f32.mrb[74].mxu1 }
 0x3ae   : > { %v1839_v40 = vadd.f32 %v3168_v38, %v3850_v24  ;;  %v1833_v41 = vpop.f32.mrb[75].mxu1 }
 0x3af   : > { %v1834_v43 = vadd.f32 %v3850_v24, %v1833_v41  ;;  %3215 = vmatprep.mubr.msk.f32.mxu0 %vm811_vm1, %v1886_v37 }
 0x3b0   : > { %3216 = vmatmul.mubr.msk.f32.gmra.mrb[72].mxu0 %vm811_vm1, %v1887_v39  ;;  %v1889_v46 = vmax.f32 %v1839_v40, 0.0 }
 0x3b1   : > { %v1888_v44 = vmax.f32 %v1834_v43, 0.0  ;;  %v3171_v45 = vpop.f32.mrb[76].mxu1 }
 0x3b2   : > { %v1849_v47 = vadd.f32 %v3171_v45, %v3850_v24  ;;  %v1843_v48 = vpop.f32.mrb[77].mxu1 }
 0x3b3   : > { %v1844_v49 = vadd.f32 %v3850_v24, %v1843_v48  ;;  %3218 = vmatprep.mubr.msk.f32.mxu0 %vm811_vm1, %v1888_v44 }
 0x3b4   : > { %3219 = vmatmul.mubr.msk.f32.gmra.mrb[74].mxu0 %vm811_vm1, %v1889_v46  ;;  %v1891_v53 = vmax.f32 %v1849_v47, 0.0 }
 0x3b5   : > { %v1890_v50 = vmax.f32 %v1844_v49, 0.0  ;;  %v3174_v51 = vpop.f32.mrb[78].mxu1 }
 0x3b6   : > { %v1859_v52 = vadd.f32 %v3174_v51, %v3850_v24  ;;  %v1853_v54 = vpop.f32.mrb[79].mxu1 }
 0x3b7   : > { %v1854_v55 = vadd.f32 %v3850_v24, %v1853_v54  ;;  %3221 = vmatprep.mubr.msk.f32.mxu0 %vm811_vm1, %v1890_v50 }
 0x3b8   : > { %3222 = vmatmul.mubr.msk.f32.gmra.mrb[76].mxu0 %vm811_vm1, %v1891_v53  ;;  %v1893_v57 = vmax.f32 %v1859_v52, 0.0 }
 0x3b9   : > { %v1892_v56 = vmax.f32 %v1854_v55, 0.0 }
 0x3bb   : > { %3224 = vmatprep.mubr.msk.f32.mxu0 %vm811_vm1, %v1892_v56 }
 0x3bc   : > { %3225 = vmatmul.mubr.msk.f32.gmra.mrb[78].mxu0 %vm811_vm1, %v1893_v57 }
 0x453   : > { %v3181_v59 = vpop.f32.mrb[48].mxu0 }
 0x454   : > { %v2071_v24 = vadd.f32 %v3181_v59, %v3920_v58  ;;  %v2065_v60 = vpop.f32.mrb[49].mxu0 }
 0x455   : > { %v2066_v61 = vadd.f32 %v3920_v58, %v2065_v60 }
 0x456   : > { %2226 = vst.msk [vmem:[%s3924_s15 + $0x8] sm:$0xff] %vm2224_vm3, %v2071_v24 }
 0x457   : > { %2225 = vst.msk [vmem:[%s3924_s15] sm:$0xff] %vm2224_vm3, %v2066_v61  ;;  %v3184_v62 = vpop.f32.mrb[50].mxu0 }
 0x458   : > { %v2081_v63 = vadd.f32 %v3184_v62, %v3920_v58  ;;  %v2075_v0 = vpop.f32.mrb[51].mxu0 }
 0x459   : > { %v2076_v1 = vadd.f32 %v3920_v58, %v2075_v0 }
 0x45a   : > { %2228 = vst.msk [vmem:[%s3924_s15 + $0x18] sm:$0xff] %vm2224_vm3, %v2081_v63 }
 0x45b   : > { %2227 = vst.msk [vmem:[%s3924_s15 + $0x10] sm:$0xff] %vm2224_vm3, %v2076_v1  ;;  %v3187_v2 = vpop.f32.mrb[52].mxu0 }
 0x45c   : > { %v2091_v3 = vadd.f32 %v3187_v2, %v3920_v58  ;;  %v2085_v4 = vpop.f32.mrb[53].mxu0 }
 0x45d   : > { %v2086_v5 = vadd.f32 %v3920_v58, %v2085_v4 }
 0x45e   : > { %2230 = vst.msk [vmem:[%s3924_s15 + $0x28] sm:$0xff] %vm2224_vm3, %v2091_v3 }
 0x45f   : > { %2229 = vst.msk [vmem:[%s3924_s15 + $0x20] sm:$0xff] %vm2224_vm3, %v2086_v5  ;;  %v3190_v6 = vpop.f32.mrb[54].mxu0 }
 0x460   : > { %v2101_v7 = vadd.f32 %v3190_v6, %v3920_v58  ;;  %v2095_v8 = vpop.f32.mrb[55].mxu0 }
 0x461   : > { %v2096_v9 = vadd.f32 %v3920_v58, %v2095_v8 }
 0x462   : > { %2232 = vst.msk [vmem:[%s3924_s15 + $0x38] sm:$0xff] %vm2224_vm3, %v2101_v7 }
 0x463   : > { %2231 = vst.msk [vmem:[%s3924_s15 + $0x30] sm:$0xff] %vm2224_vm3, %v2096_v9  ;;  %v3193_v10 = vpop.f32.mrb[56].mxu0 }
 0x464   : > { %v2111_v11 = vadd.f32 %v3193_v10, %v3920_v58  ;;  %v2105_v12 = vpop.f32.mrb[57].mxu0 }
 0x465   : > { %v2106_v13 = vadd.f32 %v3920_v58, %v2105_v12 }
 0x466   : > { %2234 = vst.msk [vmem:[%s3924_s15 + $0x48] sm:$0xff] %vm2224_vm3, %v2111_v11 }
 0x467   : > { %2233 = vst.msk [vmem:[%s3924_s15 + $0x40] sm:$0xff] %vm2224_vm3, %v2106_v13  ;;  %v3196_v14 = vpop.f32.mrb[58].mxu0 }
 0x468   : > { %v2121_v42 = vadd.f32 %v3196_v14, %v3920_v58  ;;  %v2115_v15 = vpop.f32.mrb[59].mxu0 }
 0x469   : > { %v2116_v16 = vadd.f32 %v3920_v58, %v2115_v15 }
 0x46a   : > { %2236 = vst.msk [vmem:[%s3924_s15 + $0x58] sm:$0xff] %vm2224_vm3, %v2121_v42 }
 0x46b   : > { %2235 = vst.msk [vmem:[%s3924_s15 + $0x50] sm:$0xff] %vm2224_vm3, %v2116_v16  ;;  %v3199_v18 = vpop.f32.mrb[60].mxu0 }
 0x46c   : > { %v2131_v19 = vadd.f32 %v3199_v18, %v3920_v58  ;;  %v2125_v20 = vpop.f32.mrb[61].mxu0 }
 0x46d   : > { %v2126_v21 = vadd.f32 %v3920_v58, %v2125_v20 }
 0x46e   : > { %2238 = vst.msk [vmem:[%s3924_s15 + $0x68] sm:$0xff] %vm2224_vm3, %v2131_v19 }
 0x46f   : > { %2237 = vst.msk [vmem:[%s3924_s15 + $0x60] sm:$0xff] %vm2224_vm3, %v2126_v21  ;;  %v3202_v22 = vpop.f32.mrb[62].mxu0 }
 0x470   : > { %v2141_v23 = vadd.f32 %v3202_v22, %v3920_v58  ;;  %v2135_v25 = vpop.f32.mrb[63].mxu0 }
 0x471   : > { %v2136_v26 = vadd.f32 %v3920_v58, %v2135_v25 }
 0x472   : > { %2240 = vst.msk [vmem:[%s3924_s15 + $0x78] sm:$0xff] %vm2224_vm3, %v2141_v23 }
 0x473   : > { %2239 = vst.msk [vmem:[%s3924_s15 + $0x70] sm:$0xff] %vm2224_vm3, %v2136_v26  ;;  %v3205_v27 = vpop.f32.mrb[64].mxu0 }
 0x474   : > { %v2151_v17 = vadd.f32 %v3205_v27, %v3920_v58  ;;  %v2145_v28 = vpop.f32.mrb[65].mxu0 }
 0x475   : > { %v2146_v29 = vadd.f32 %v3920_v58, %v2145_v28 }
 0x476   : > { %2242 = vst.msk [vmem:[%s3924_s15 + $0x88] sm:$0xff] %vm2224_vm3, %v2151_v17 }
 0x477   : > { %2241 = vst.msk [vmem:[%s3924_s15 + $0x80] sm:$0xff] %vm2224_vm3, %v2146_v29  ;;  %v3208_v30 = vpop.f32.mrb[66].mxu0 }
 0x478   : > { %v2161_v31 = vadd.f32 %v3208_v30, %v3920_v58  ;;  %v2155_v32 = vpop.f32.mrb[67].mxu0 }
 0x479   : > { %v2156_v33 = vadd.f32 %v3920_v58, %v2155_v32 }
 0x47a   : > { %2244 = vst.msk [vmem:[%s3924_s15 + $0x98] sm:$0xff] %vm2224_vm3, %v2161_v31 }
 0x47b   : > { %2243 = vst.msk [vmem:[%s3924_s15 + $0x90] sm:$0xff] %vm2224_vm3, %v2156_v33  ;;  %v3211_v34 = vpop.f32.mrb[68].mxu0 }
 0x47c   : > { %v2171_v35 = vadd.f32 %v3211_v34, %v3920_v58  ;;  %v2165_v36 = vpop.f32.mrb[69].mxu0 }
 0x47d   : > { %v2166_v37 = vadd.f32 %v3920_v58, %v2165_v36 }
 0x47e   : > { %2246 = vst.msk [vmem:[%s3924_s15 + $0xa8] sm:$0xff] %vm2224_vm3, %v2171_v35 }
 0x47f   : > { %2245 = vst.msk [vmem:[%s3924_s15 + $0xa0] sm:$0xff] %vm2224_vm3, %v2166_v37  ;;  %v3214_v38 = vpop.f32.mrb[70].mxu0 }
 0x480   : > { %v2181_v39 = vadd.f32 %v3214_v38, %v3920_v58  ;;  %v2175_v40 = vpop.f32.mrb[71].mxu0 }
 0x481   : > { %v2176_v41 = vadd.f32 %v3920_v58, %v2175_v40 }
 0x482   : > { %2248 = vst.msk [vmem:[%s3924_s15 + $0xb8] sm:$0xff] %vm2224_vm3, %v2181_v39 }
 0x483   : > { %2247 = vst.msk [vmem:[%s3924_s15 + $0xb0] sm:$0xff] %vm2224_vm3, %v2176_v41  ;;  %v3217_v43 = vpop.f32.mrb[72].mxu0 }
 0x484   : > { %v2191_v44 = vadd.f32 %v3217_v43, %v3920_v58  ;;  %v2185_v45 = vpop.f32.mrb[73].mxu0 }
 0x485   : > { %v2186_v46 = vadd.f32 %v3920_v58, %v2185_v45 }
 0x486   : > { %2250 = vst.msk [vmem:[%s3924_s15 + $0xc8] sm:$0xff] %vm2224_vm3, %v2191_v44 }
 0x487   : > { %2249 = vst.msk [vmem:[%s3924_s15 + $0xc0] sm:$0xff] %vm2224_vm3, %v2186_v46  ;;  %v3220_v47 = vpop.f32.mrb[74].mxu0 }
 0x488   : > { %v2201_v48 = vadd.f32 %v3220_v47, %v3920_v58  ;;  %v2195_v49 = vpop.f32.mrb[75].mxu0 }
 0x489   : > { %v2196_v50 = vadd.f32 %v3920_v58, %v2195_v49 }
 0x48a   : > { %2252 = vst.msk [vmem:[%s3924_s15 + $0xd8] sm:$0xff] %vm2224_vm3, %v2201_v48 }
 0x48b   : > { %2251 = vst.msk [vmem:[%s3924_s15 + $0xd0] sm:$0xff] %vm2224_vm3, %v2196_v50  ;;  %v3223_v51 = vpop.f32.mrb[76].mxu0 }
 0x48c   : > { %v2211_v53 = vadd.f32 %v3223_v51, %v3920_v58  ;;  %v2205_v52 = vpop.f32.mrb[77].mxu0 }
 0x48d   : > { %v2206_v54 = vadd.f32 %v3920_v58, %v2205_v52  ;;  %2263 = sbr.rel (!%p3514_p4) target bundleno = 1228 (0x4cc), region = 68 }
 0x48e   : > { %2254 = vst.msk [vmem:[%s3924_s15 + $0xe8] sm:$0xff] %vm2224_vm3, %v2211_v53 }
 0x48f   : > { %2253 = vst.msk [vmem:[%s3924_s15 + $0xe0] sm:$0xff] %vm2224_vm3, %v2206_v54  ;;  %v3226_v55 = vpop.f32.mrb[78].mxu0 }
 0x490   : > { %v2221_v56 = vadd.f32 %v3226_v55, %v3920_v58  ;;  %v2215_v57 = vpop.f32.mrb[79].mxu0 }
 0x491   : > { %v2216_v59 = vadd.f32 %v3920_v58, %v2215_v57 }
 0x492   : > { %2256 = vst.msk [vmem:[%s3924_s15 + $0xf8] sm:$0xff] %vm2224_vm3, %v2221_v56 }
 0x493   : > { %2255 = vst.msk [vmem:[%s3924_s15 + $0xf0] sm:$0xff] %vm2224_vm3, %v2216_v59 }
 0x494   : > { %s4181_s17 = smov (!%p2266_p8, %s2265_s17), 32 }
 0x495   : > { %s2770_s26 = sshll.u32 %s4181_s17, 7 }
 0x496   : > { %p2773_p9 = scmp.eq.s32.totalorder %s2770_s26, 0 }
 0x497   : > { %s4033_s27 = sshrl.u32 (!%p2773_p9), %s4181_s17, 5 }
 0x498   : > { %2274 = sbr.rel (%p2773_p9) target bundleno = 1228 (0x4cc), region = 72  ;;  %p2774_p10 = scmp.le.s32.totalorder (!%p2773_p9), %s4033_s27, 0 }
 0x49f   : > { %2552 = sbr.rel (%p2774_p10) target bundleno = 1207 (0x4b7), region = 148  ;;  %s4172_s20 = smov (!%p2774_p10), %s4027_s23 }
 0x4a0   : > { %s4173_s25 = smov (!%p2774_p10), %s3924_s15  ;;  %s4042_s28 = smov (!%p2774_p10), 0  }
 0x4a1   : > { %s4044_s29 = smov (!%p2774_p10), 0  }
 0x4a6 LB: >> { %v2398_v58 = vld [vmem:[%s3403_s25] sm:$0xff]  ;;  %v2400_v24 = vld [vmem:[%s3403_s25 + $0x8] sm:$0xff]  ;;  %v2402_v60 = vld [vmem:[%s3403_s25 + $0x10] sm:$0xff]  ;;  %s2462_s30 = sadd.s32 1, %s3407_s28  ;;  %s2392_s29 = sadd.s32 1, %s3411_s29   ;;  %s3411_s29 = sphi %s4044_s29, %s2392_s29   ;;  %s3407_s28 = sphi %s4042_s28, %s4176_s28   ;;  %s3403_s25 = sphi %s4173_s25, %s4175_s25   ;;  %s3399_s20 = sphi %s4172_s20, %s4174_s20  }
 0x4a7   : >> { %2399 = vst [vmem:[%s3399_s20] sm:$0xff] %v2398_v58  ;;  %2401 = vst [vmem:[%s3399_s20 + $0x8] sm:$0xff] %v2400_v24  ;;  %v2404_v61 = vld [vmem:[%s3403_s25 + $0x18] sm:$0xff]  ;;  %v2406_v62 = vld [vmem:[%s3403_s25 + $0x20] sm:$0xff]  ;;  %p2463_p11 = scmp.ge.s32.totalorder %s2462_s30, %s4033_s27  ;;  %p2391_p12 = scmp.ge.s32.totalorder %s2392_s29, %s4033_s27 }
 0x4a8   : >> { %2403 = vst [vmem:[%s3399_s20 + $0x10] sm:$0xff] %v2402_v60  ;;  %v2408_v63 = vld [vmem:[%s3403_s25 + $0x28] sm:$0xff]  ;;  %2405 = vst [vmem:[%s3399_s20 + $0x18] sm:$0xff] %v2404_v61  ;;  %v2410_v0 = vld [vmem:[%s3403_s25 + $0x30] sm:$0xff] }
 0x4a9   : >> { %2407 = vst [vmem:[%s3399_s20 + $0x20] sm:$0xff] %v2406_v62  ;;  %2409 = vst [vmem:[%s3399_s20 + $0x28] sm:$0xff] %v2408_v63  ;;  %v2412_v1 = vld [vmem:[%s3403_s25 + $0x38] sm:$0xff]  ;;  %v2414_v2 = vld [vmem:[%s3403_s25 + $0x40] sm:$0xff]  ;;  %s4183_s30 = smov (%p2463_p11, %s2462_s30), 0 }
 0x4aa   : >> { %2411 = vst [vmem:[%s3399_s20 + $0x30] sm:$0xff] %v2410_v0  ;;  %2413 = vst [vmem:[%s3399_s20 + $0x38] sm:$0xff] %v2412_v1  ;;  %v2416_v3 = vld [vmem:[%s3403_s25 + $0x48] sm:$0xff]  ;;  %v2418_v4 = vld [vmem:[%s3403_s25 + $0x50] sm:$0xff]  ;;  %s2775_s12 = sshll.u32 %s4183_s30, 8  ;;  %s4176_s28 = smov %s4183_s30 }
 0x4ab   : >> { %2415 = vst [vmem:[%s3399_s20 + $0x40] sm:$0xff] %v2414_v2  ;;  %v2420_v5 = vld [vmem:[%s3403_s25 + $0x58] sm:$0xff]  ;;  %2417 = vst [vmem:[%s3399_s20 + $0x48] sm:$0xff] %v2416_v3  ;;  %v2422_v6 = vld [vmem:[%s3403_s25 + $0x60] sm:$0xff]  ;;  %s4100_s13 = scalar_lea.vmem %s3924_s15, %s2775_s12 [#allocation2]   ;;  %s2468_s14 = scalar_lea.vmem %s4027_s23, %s2775_s12  }
 0x4ac   : >> { %2419 = vst [vmem:[%s3399_s20 + $0x50] sm:$0xff] %v2418_v4  ;;  %2421 = vst [vmem:[%s3399_s20 + $0x58] sm:$0xff] %v2420_v5  ;;  %v2424_v7 = vld [vmem:[%s3403_s25 + $0x68] sm:$0xff]  ;;  %v2426_v8 = vld [vmem:[%s3403_s25 + $0x70] sm:$0xff] }
 0x4ad   : >> { %2423 = vst [vmem:[%s3399_s20 + $0x60] sm:$0xff] %v2422_v6  ;;  %2425 = vst [vmem:[%s3399_s20 + $0x68] sm:$0xff] %v2424_v7  ;;  %v2428_v9 = vld [vmem:[%s3403_s25 + $0x78] sm:$0xff]  ;;  %v2430_v10 = vld [vmem:[%s3403_s25 + $0x80] sm:$0xff] }
 0x4ae   : >> { %2427 = vst [vmem:[%s3399_s20 + $0x70] sm:$0xff] %v2426_v8  ;;  %v2432_v11 = vld [vmem:[%s3403_s25 + $0x88] sm:$0xff]  ;;  %2429 = vst [vmem:[%s3399_s20 + $0x78] sm:$0xff] %v2428_v9  ;;  %v2434_v12 = vld [vmem:[%s3403_s25 + $0x90] sm:$0xff] }
 0x4af   : >> { %2431 = vst [vmem:[%s3399_s20 + $0x80] sm:$0xff] %v2430_v10  ;;  %2433 = vst [vmem:[%s3399_s20 + $0x88] sm:$0xff] %v2432_v11  ;;  %v2436_v13 = vld [vmem:[%s3403_s25 + $0x98] sm:$0xff]  ;;  %v2438_v14 = vld [vmem:[%s3403_s25 + $0xa0] sm:$0xff] }
 0x4b0   : >> { %2435 = vst [vmem:[%s3399_s20 + $0x90] sm:$0xff] %v2434_v12  ;;  %2437 = vst [vmem:[%s3399_s20 + $0x98] sm:$0xff] %v2436_v13  ;;  %v2440_v42 = vld [vmem:[%s3403_s25 + $0xa8] sm:$0xff]  ;;  %v2442_v15 = vld [vmem:[%s3403_s25 + $0xb0] sm:$0xff]  ;;  %2394 = sbr.rel (!%p2391_p12) target bundleno = 1190 (0x4a6), region = 154 }
 0x4b1   : >> { %2439 = vst [vmem:[%s3399_s20 + $0xa0] sm:$0xff] %v2438_v14  ;;  %v2444_v16 = vld [vmem:[%s3403_s25 + $0xb8] sm:$0xff]  ;;  %2441 = vst [vmem:[%s3399_s20 + $0xa8] sm:$0xff] %v2440_v42  ;;  %v2446_v18 = vld [vmem:[%s3403_s25 + $0xc0] sm:$0xff] }
 0x4b2   : >> { %2443 = vst [vmem:[%s3399_s20 + $0xb0] sm:$0xff] %v2442_v15  ;;  %2445 = vst [vmem:[%s3399_s20 + $0xb8] sm:$0xff] %v2444_v16  ;;  %v2448_v19 = vld [vmem:[%s3403_s25 + $0xc8] sm:$0xff]  ;;  %v2450_v20 = vld [vmem:[%s3403_s25 + $0xd0] sm:$0xff] }
 0x4b3   : >> { %2447 = vst [vmem:[%s3399_s20 + $0xc0] sm:$0xff] %v2446_v18  ;;  %2449 = vst [vmem:[%s3399_s20 + $0xc8] sm:$0xff] %v2448_v19  ;;  %v2452_v21 = vld [vmem:[%s3403_s25 + $0xd8] sm:$0xff]  ;;  %v2454_v22 = vld [vmem:[%s3403_s25 + $0xe0] sm:$0xff] }
 0x4b4   : >> { %2451 = vst [vmem:[%s3399_s20 + $0xd0] sm:$0xff] %v2450_v20  ;;  %v2456_v23 = vld [vmem:[%s3403_s25 + $0xe8] sm:$0xff]  ;;  %2453 = vst [vmem:[%s3399_s20 + $0xd8] sm:$0xff] %v2452_v21  ;;  %v2458_v25 = vld [vmem:[%s3403_s25 + $0xf0] sm:$0xff] }
 0x4b5   : >> { %2455 = vst [vmem:[%s3399_s20 + $0xe0] sm:$0xff] %v2454_v22  ;;  %2457 = vst [vmem:[%s3399_s20 + $0xe8] sm:$0xff] %v2456_v23  ;;  %v2460_v26 = vld [vmem:[%s3403_s25 + $0xf8] sm:$0xff]  ;;  %s4175_s25 = smov %s4100_s13 }
 0x4b6   : >> { %2459 = vst [vmem:[%s3399_s20 + $0xf0] sm:$0xff] %v2458_v25  ;;  %2461 = vst [vmem:[%s3399_s20 + $0xf8] sm:$0xff] %v2460_v26  ;;  %s4174_s20 = smov %s2468_s14 }
 0x4b7 PF: > { %s4141_s16 = sand.u32 31, %s4181_s17   ;;  %s2786_s19 = sshll.u32 %s4033_s27, 8 }
 0x4b8   : > { %s2473_s22 = scalar_lea.vmem %s3924_s15, %s2786_s19 [#allocation2]   ;;  %s2475_s26 = scalar_lea.vmem %s4027_s23, %s2786_s19  }
 0x4b9   : > { %p2780_p13 = scmp.le.s32.totalorder %s4141_s16, 0 }
 0x4ba   : > { %s3413_s12 = smov (!%p2780_p13), %s2475_s26   ;;  %s3417_s13 = smov (!%p2780_p13), %s2473_s22  }
 0x4bb   : > { %2566 = sbr.rel (%p2780_p13) target bundleno = 1228 (0x4cc), region = 159  ;;  %s3421_s14 = smov (!%p2780_p13), 0  }
 0x4bc   : > { %s3425_s30 = smov (!%p2780_p13), 0  }
 0x4c2 LB: >> { %v2485_v27 = vld [vmem:[%s3419_s13] sm:$0xff]  ;;  %s2487_s17 = sadd.s32 1, %s3423_s14  ;;  %s2479_s30 = sadd.s32 1, %s3427_s30   ;;  %s3427_s30 = sphi %s3425_s30, %s2479_s30   ;;  %s3423_s14 = sphi %s3421_s14, %s3422_s14   ;;  %s3419_s13 = sphi %s3417_s13, %s2492_s13   ;;  %s3415_s12 = sphi %s3413_s12, %s2493_s12  }
 0x4c3   : >> { %2486 = vst [vmem:[%s3415_s12] sm:$0xff] %v2485_v27  ;;  %p2488_p0 = scmp.ge.s32.totalorder %s2487_s17, %s4141_s16  ;;  %p2478_p1 = scmp.ge.s32.totalorder %s2479_s30, %s4141_s16 }
 0x4c5   : >> { %s4185_s17 = smov (%p2488_p0, %s2487_s17), 0  ;;  %2481 = sbr.rel (!%p2478_p1) target bundleno = 1218 (0x4c2), region = 165 }
 0x4c6   : >> { %s2781_s15 = sshll.u32 %s4185_s17, 3  ;;  %s3422_s14 = smov %s4185_s17  }
 0x4c7   : >> { %s2492_s13 = scalar_lea.vmem %s2473_s22, %s2781_s15 [#allocation2]   ;;  %s2493_s12 = scalar_lea.vmem %s2475_s26, %s2781_s15  }
 0x4cc PF: > { %p18_p2 = scmp.ge.s32.totalorder %s3504_s21, 4   ;;  %s4177_s17 = smov %s3391_s18 }
 0x4cd   : > { %s4178_s18 = smov %s3512_s24  ;;  %s4179_s19 = smov %s3504_s21 }
 0x4ce   :  { %20 = sbr.rel (!%p18_p2) target bundleno = 2 (0x2), region = 176 }

</bundles_post_ra>
